<compile_context>
chip_gen: v7x
topology: tpu7x:2x2x1
jax: 0.10.0
libtpu: 0.0.40
codegen_flags: <defaults>
</compile_context>

<pallas_src>
import functools

import jax
import jax.numpy as jnp
from jax.experimental import pallas as pl
from jax.experimental.pallas import tpu as pltpu

# ----------------------------- model config ---------------------------------
B = 2          # batch (number of sentences)
S = 8          # padded sequence length (pieces)
H = 32         # hidden size (emb_dim of the module)
NH = 4         # attention heads
HD = H // NH   # head dim
F = 64         # FFN intermediate size
VOCAB = 64
MAX_POS = 16
TYPE_VOCAB = 2
N_LAYERS = 2
LN_EPS = 1e-12
NEG_INF = -1e9


# ----------------------------- kernel helpers --------------------------------
def _layer_norm(x, gamma, beta):
    # x: (B*S, H) f32, gamma/beta: (1, H) f32
    mu = jnp.mean(x, axis=-1, keepdims=True)
    var = jnp.mean((x - mu) ** 2, axis=-1, keepdims=True)
    return (x - mu) * jax.lax.rsqrt(var + LN_EPS) * gamma + beta


# ----------------------------- fused Pallas kernel ---------------------------
def fused_forward_kernel(ids_ref, mask_ref, wvocab_ref, pt_ref, embln_ref,
                         wqkv_ref, bqkv_ref, wo_ref,
                         w1_ref, b1_ref, w2_ref, vec_ref,
                         o_ref, *, sel):
    """Whole transformer forward (up to hidden_states[sel]), single invocation.

    ids_ref : (B*S, 1) i32      token ids
    mask_ref: (B, 1, S) f32     1.0 = valid token
    wvocab_ref: (VOCAB, H) f32  word embedding table
    pt_ref  : (B*S, H) f32      pos+type embeddings, pre-summed & pre-tiled
    embln_ref: (2, H) f32       embedding LN gamma/beta
    wqkv_ref: (L, B*NH, H, 3*HD) bf16   per-(batch,head) fused QKV (q pre-scaled)
    bqkv_ref: (L, B*NH, 1, 3*HD) f32
    wo_ref  : (L, B*NH, HD, H) bf16     per-head output projection rows
    w1_ref  : (L, H, F) bf16,  b1_ref: (L, 1, F) f32
    w2_ref  : (L, F, H) bf16
    vec_ref : (L, 6, H) f32     rows: bo, ln1_g, ln1_b, b2, ln2_g, ln2_b
    o_ref   : (B*S, H) f32      hidden_states[sel]
    """
    Z = B * NH

    # ---- embeddings: exact one-hot gather on the MXU + pos/type add --------
    ids = ids_ref[...]                                                # (B*S, 1) i32
    onehot = (jax.lax.broadcasted_iota(jnp.int32, (B * S, VOCAB), 1)
              == ids).astype(jnp.float32)                             # (B*S, VOCAB)
    emb = jnp.dot(onehot, wvocab_ref[...],
                  preferred_element_type=jnp.float32) + pt_ref[...]   # (B*S, H)

    # Embedding layernorm (hidden_states[0]).
    x = _layer_norm(emb, embln_ref[0:1, :], embln_ref[1:2, :])        # (B*S, H)
    if sel == 0:
        o_ref[...] = x

    if sel > 0:
        # Key-mask additive bias, hoisted out of the layer loop: (B*NH, 1, S).
        neg_bias = jnp.broadcast_to(
            ((1.0 - mask_ref[...]) * NEG_INF)[:, None, :, :],
            (B, NH, 1, S)).reshape(Z, 1, S)

        for l in range(sel):                 # static unroll; only needed layers
            vec = vec_ref[l]                 # (6, H)
            bo, ln1_g, ln1_b = vec[0:1, :], vec[1:2, :], vec[2:3, :]
            b2, ln2_g, ln2_b = vec[3:4, :], vec[4:5, :], vec[5:6, :]

            # ---- multi-head self-attention, (B*NH)-batched einsums ----------
            xh = jnp.broadcast_to(x.reshape(B, 1, S, H),
                                  (B, NH, S, H)).reshape(Z, S, H)
            xh = xh.astype(jnp.bfloat16)

            qkv = jnp.einsum('zsh,zhk->zsk', xh, wqkv_ref[l],
                             preferred_element_type=jnp.float32) + bqkv_ref[l]
            q = qkv[..., 0:HD].astype(jnp.bfloat16)      # query pre-scaled by 1/sqrt(HD)
            k = qkv[..., HD:2 * HD].astype(jnp.bfloat16)
            v = qkv[..., 2 * HD:3 * HD].astype(jnp.bfloat16)

            s = jnp.einsum('zqd,zkd->zqk', q, k,
                           preferred_element_type=jnp.float32)        # (Z, S, S)
            s = s + neg_bias                                          # mask keys
            s = s - jnp.max(s, axis=-1, keepdims=True)
            p = jnp.exp(s)
            p = p * pl.reciprocal(jnp.sum(p, axis=-1, keepdims=True), approx=True)

            ctx = jnp.einsum('zqk,zkd->zqd', p.astype(jnp.bfloat16), v,
                             preferred_element_type=jnp.float32)      # (Z, S, HD)
            # Per-head output projection; summing heads == concat(ctx) @ Wo.
            ob = jnp.einsum('zsd,zdh->zsh', ctx.astype(jnp.bfloat16), wo_ref[l],
                            preferred_element_type=jnp.float32)       # (Z, S, H)
            attn = jnp.sum(ob.reshape(B, NH, S, H), axis=1).reshape(B * S, H) + bo

            h1 = _layer_norm(x + attn, ln1_g, ln1_b)

            # ---- FFN ----
            f1 = jnp.dot(h1.astype(jnp.bfloat16), w1_ref[l],
                         preferred_element_type=jnp.float32) + b1_ref[l]  # (B*S, F)
            f1 = jax.nn.gelu(f1)
            f2 = jnp.dot(f1.astype(jnp.bfloat16), w2_ref[l],
                         preferred_element_type=jnp.float32) + b2         # (B*S, H)
            x = _layer_norm(h1 + f2, ln2_g, ln2_b)

            if l + 1 == sel:
                o_ref[...] = x


# ----------------------------- Pallas wrapper --------------------------------
@functools.partial(jax.jit, static_argnames=("sel",))
def fused_transformer(ids2d, mask_f, packed, *, sel):
    """ids2d: (B*S, 1) i32, mask_f: (B, 1, S) f32, packed: stacked params."""
    vmem = functools.partial(pl.BlockSpec, memory_space=pltpu.MemorySpace.VMEM)
    n_in = 2 + len(packed)
    # Single no-grid call: everything lives in VMEM (a few hundred KiB, fits
    # every generation including v7x's 64 MiB with huge headroom).
    # TODO(synk): on v7x, a 2-wide "parallel" grid over B would let both
    # TensorCores share the work; omitted to keep one grid step (best for the
    # single-TC v5e/v6e targets at this size).
    return pl.pallas_call(
        functools.partial(fused_forward_kernel, sel=sel),
        out_shape=jax.ShapeDtypeStruct((ids2d.shape[0], H), jnp.float32),
        in_specs=[vmem() for _ in range(n_in)],
        out_specs=vmem(),
    )(ids2d, mask_f, *packed)


# ----------------------------- parameter init --------------------------------
def init_params(key):
    keys = iter(jax.random.split(key, 64))

    def nrm(shape, scale=0.02):
        return (scale * jax.random.normal(next(keys), shape)).astype(jnp.float32)

    params = {
        "word_emb": nrm((VOCAB, H)),
        "pos_emb": nrm((MAX_POS, H)),
        "type_emb": nrm((TYPE_VOCAB, H)),
        "emb_ln_g": jnp.ones((H,), jnp.float32),
        "emb_ln_b": jnp.zeros((H,), jnp.float32),
        "layers": [],
    }
    for _ in range(N_LAYERS):
        params["layers"].append(dict(
            wq=nrm((H, H)), bq=jnp.zeros((H,), jnp.float32),
            wk=nrm((H, H)), bk=jnp.zeros((H,), jnp.float32),
            wv=nrm((H, H)), bv=jnp.zeros((H,), jnp.float32),
            wo=nrm((H, H)), bo=jnp.zeros((H,), jnp.float32),
            ln1_g=jnp.ones((H,), jnp.float32), ln1_b=jnp.zeros((H,), jnp.float32),
            w1=nrm((H, F)), b1=jnp.zeros((F,), jnp.float32),
            w2=nrm((F, H)), b2=jnp.zeros((H,), jnp.float32),
            ln2_g=jnp.ones((H,), jnp.float32), ln2_b=jnp.zeros((H,), jnp.float32),
        ))
    return params


def pack_params(params):
    """Wrapper-side layout plumbing (done once, outside the kernel):
    stack per-layer weights along a leading layer axis, lay out QKV/Wo with a
    (batch*head) leading axis, fold 1/sqrt(HD) into the query weight/bias,
    pre-sum & pre-tile pos+type embeddings, cast matmul weights to bf16, and
    pack the small per-layer vectors."""
    scale = 1.0 / (HD ** 0.5)

    def heads(w):        # (H, H) -> (NH, H, HD): head n = w[:, n*HD:(n+1)*HD]
        return w.reshape(H, NH, HD).transpose(1, 0, 2)

    wqkv_l, bqkv_l, wo_l, w1_l, b1_l, w2_l, vec_l = ([] for _ in range(7))
    for lp in params["layers"]:
        whead = jnp.concatenate(
            [heads(lp["wq"] * scale), heads(lp["wk"]), heads(lp["wv"])], axis=-1)
        bhead = jnp.concatenate(
            [(lp["bq"] * scale).reshape(NH, 1, HD),
             lp["bk"].reshape(NH, 1, HD),
             lp["bv"].reshape(NH, 1, HD)], axis=-1)
        wqkv_l.append(jnp.tile(whead, (B, 1, 1)))                    # (B*NH, H, 3HD)
        bqkv_l.append(jnp.tile(bhead, (B, 1, 1)))                    # (B*NH, 1, 3HD)
        wo_l.append(jnp.tile(lp["wo"].reshape(NH, HD, H), (B, 1, 1)))  # (B*NH, HD, H)
        w1_l.append(lp["w1"])
        b1_l.append(lp["b1"].reshape(1, F))
        w2_l.append(lp["w2"])
        vec_l.append(jnp.stack(
            [lp["bo"], lp["ln1_g"], lp["ln1_b"],
             lp["b2"], lp["ln2_g"], lp["ln2_b"]], axis=0))

    pos_type = params["pos_emb"][:S] + params["type_emb"][0][None, :]  # (S, H)
    return (
        params["word_emb"].astype(jnp.float32),                       # (VOCAB, H)
        jnp.tile(pos_type, (B, 1)).astype(jnp.float32),               # (B*S, H)
        jnp.stack([params["emb_ln_g"], params["emb_ln_b"]], axis=0),  # (2, H)
        jnp.stack(wqkv_l).astype(jnp.bfloat16),    # (L, B*NH, H, 3*HD)
        jnp.stack(bqkv_l).astype(jnp.float32),     # (L, B*NH, 1, 3*HD)
        jnp.stack(wo_l).astype(jnp.bfloat16),      # (L, B*NH, HD, H)
        jnp.stack(w1_l).astype(jnp.bfloat16),      # (L, H, F)
        jnp.stack(b1_l).astype(jnp.float32),       # (L, 1, F)
        jnp.stack(w2_l).astype(jnp.bfloat16),      # (L, F, H)
        jnp.stack(vec_l).astype(jnp.float32),      # (L, 6, H)
    )


# ----------------------------- module forward --------------------------------
def transformer_embeddings_forward(params, packed, input_ids, attention_mask,
                                   lm_layer=-1):
    """Mirrors TransformerEmbeddings.forward with _tokenized=False:
    returns (hidden_states[lm_layer], attention_mask)."""
    sel = lm_layer % (N_LAYERS + 1)                 # index into hidden_states
    ids2d = input_ids.reshape(-1, 1).astype(jnp.int32)       # (B*S, 1)
    mask_f = attention_mask.astype(jnp.float32)[:, None, :]  # (B, 1, S)

    hidden = fused_transformer(ids2d, mask_f, packed, sel=sel)   # (B*S, H)
    emb_pieces = hidden.reshape(input_ids.shape[0], input_ids.shape[1], H)
    return emb_pieces, attention_mask


# TODO(synk): tokenization (string -> ids) and the ragged wordpiece->word
# `reduce` averaging (only used when tokenized=True) have no clean Pallas
# equivalent; forward here follows the default tokenized=False path.

# ----------------------------- main -----------------------------------------
if __name__ == "__main__":
    key = jax.random.PRNGKey(0)
    k_param, k_ids = jax.random.split(key)

    params = init_params(k_param)
    packed = pack_params(params)

    # Synthetic "tokenized" batch of 2 sentences, padded to S=8.
    input_ids = jax.random.randint(k_ids, (B, S), 0, VOCAB, dtype=jnp.int32)
    lengths = jnp.array([8, 6], dtype=jnp.int32)
    attention_mask = (jnp.arange(S)[None, :] < lengths[:, None]).astype(jnp.int32)
    input_ids = input_ids * attention_mask  # pad token id = 0

    emb_pieces, att_mask = transformer_embeddings_forward(
        params, packed, input_ids, attention_mask, lm_layer=-1
    )
    emb_pieces = jax.block_until_ready(emb_pieces)
    att_mask = jax.block_until_ready(att_mask)

    assert emb_pieces.shape == (B, S, H)
    assert att_mask.shape == (B, S)
    assert bool(jnp.all(jnp.isfinite(emb_pieces)))
    print("KERNEL_OK")
</pallas_src>

<mosaic_0001>
module attributes {stable_mosaic.version = 11 : i64} {
  func.func @fused_forward_kernel(%arg0: memref<16x1xi32, #tpu.memory_space<vmem>>, %arg1: memref<2x1x8xf32, #tpu.memory_space<vmem>>, %arg2: memref<64x32xf32, #tpu.memory_space<vmem>>, %arg3: memref<16x32xf32, #tpu.memory_space<vmem>>, %arg4: memref<2x32xf32, #tpu.memory_space<vmem>>, %arg5: memref<2x8x32x24xbf16, #tpu.memory_space<vmem>>, %arg6: memref<2x8x1x24xf32, #tpu.memory_space<vmem>>, %arg7: memref<2x8x8x32xbf16, #tpu.memory_space<vmem>>, %arg8: memref<2x32x64xbf16, #tpu.memory_space<vmem>>, %arg9: memref<2x1x64xf32, #tpu.memory_space<vmem>>, %arg10: memref<2x64x32xbf16, #tpu.memory_space<vmem>>, %arg11: memref<2x6x32xf32, #tpu.memory_space<vmem>>, %arg12: memref<16x32xf32, #tpu.memory_space<vmem>>) attributes {dimension_semantics = [], scalar_prefetch = 0 : i64, scratch_operands = 0 : i64, tpu.core_type = #tpu.core_type<tc>} {
    %c0 = arith.constant 0 : index
    %c0_0 = arith.constant 0 : index
    %0 = vector.load %arg0[%c0, %c0_0] : memref<16x1xi32, #tpu.memory_space<vmem>>, vector<16x1xi32>
    %1 = tpu.iota {dimensions = array<i32: 1>} : vector<16x64xi32>
    %2 = vector.broadcast %0 : vector<16x1xi32> to vector<16x64xi32>
    %3 = arith.cmpi eq, %1, %2 : vector<16x64xi32>
    %4 = arith.extui %3 : vector<16x64xi1> to vector<16x64xi32>
    %5 = arith.sitofp %4 : vector<16x64xi32> to vector<16x64xf32>
    %c0_1 = arith.constant 0 : index
    %c0_2 = arith.constant 0 : index
    %6 = vector.load %arg2[%c0_1, %c0_2] : memref<64x32xf32, #tpu.memory_space<vmem>>, vector<64x32xf32>
    %cst = arith.constant dense<0.000000e+00> : vector<16x32xf32>
    %7 = tpu.matmul %5, %6, %cst {dimension_numbers = #tpu.dot_dimension_numbers<[1], [0], [0], [1], [0, 0, 1, 1], [], []>} : vector<16x64xf32>, vector<64x32xf32>, vector<16x32xf32> -> vector<16x32xf32>
    %c0_3 = arith.constant 0 : index
    %c0_4 = arith.constant 0 : index
    %8 = vector.load %arg3[%c0_3, %c0_4] : memref<16x32xf32, #tpu.memory_space<vmem>>, vector<16x32xf32>
    %9 = arith.addf %7, %8 : vector<16x32xf32>
    %c0_5 = arith.constant 0 : index
    %c0_6 = arith.constant 0 : index
    %10 = vector.load %arg4[%c0_5, %c0_6] : memref<2x32xf32, #tpu.memory_space<vmem>>, vector<1x32xf32>
    %c1 = arith.constant 1 : index
    %c0_7 = arith.constant 0 : index
    %11 = vector.load %arg4[%c1, %c0_7] : memref<2x32xf32, #tpu.memory_space<vmem>>, vector<1x32xf32>
    %cst_8 = arith.constant dense<0.000000e+00> : vector<16xf32>
    %12 = vector.multi_reduction <add>, %9, %cst_8 [1] : vector<16x32xf32> to vector<16xf32>
    %13 = vector.shape_cast %12 : vector<16xf32> to vector<16x1xf32>
    %cst_9 = arith.constant 3.200000e+01 : f32
    %14 = vector.broadcast %cst_9 : f32 to vector<16x1xf32>
    %15 = arith.divf %13, %14 : vector<16x1xf32>
    %16 = vector.broadcast %15 : vector<16x1xf32> to vector<16x32xf32>
    %17 = arith.subf %9, %16 : vector<16x32xf32>
    %18 = arith.mulf %17, %17 : vector<16x32xf32>
    %cst_10 = arith.constant dense<0.000000e+00> : vector<16xf32>
    %19 = vector.multi_reduction <add>, %18, %cst_10 [1] : vector<16x32xf32> to vector<16xf32>
    %20 = vector.shape_cast %19 : vector<16xf32> to vector<16x1xf32>
    %cst_11 = arith.constant 3.200000e+01 : f32
    %21 = vector.broadcast %cst_11 : f32 to vector<16x1xf32>
    %22 = arith.divf %20, %21 : vector<16x1xf32>
    %23 = vector.broadcast %15 : vector<16x1xf32> to vector<16x32xf32>
    %24 = arith.subf %9, %23 : vector<16x32xf32>
    %cst_12 = arith.constant 9.99999996E-13 : f32
    %25 = vector.broadcast %cst_12 : f32 to vector<16x1xf32>
    %26 = arith.addf %22, %25 : vector<16x1xf32>
    %27 = math.rsqrt %26 : vector<16x1xf32>
    %28 = vector.broadcast %27 : vector<16x1xf32> to vector<16x32xf32>
    %29 = arith.mulf %24, %28 : vector<16x32xf32>
    %30 = vector.broadcast %10 : vector<1x32xf32> to vector<16x32xf32>
    %31 = arith.mulf %29, %30 : vector<16x32xf32>
    %32 = vector.broadcast %11 : vector<1x32xf32> to vector<16x32xf32>
    %33 = arith.addf %31, %32 : vector<16x32xf32>
    %c0_13 = arith.constant 0 : index
    %c0_14 = arith.constant 0 : index
    %c0_15 = arith.constant 0 : index
    %34 = vector.load %arg1[%c0_13, %c0_14, %c0_15] : memref<2x1x8xf32, #tpu.memory_space<vmem>>, vector<2x1x8xf32>
    %cst_16 = arith.constant 1.000000e+00 : f32
    %35 = vector.broadcast %cst_16 : f32 to vector<2x1x8xf32>
    %36 = arith.subf %35, %34 : vector<2x1x8xf32>
    %cst_17 = arith.constant -1.000000e+09 : f32
    %37 = vector.broadcast %cst_17 : f32 to vector<2x1x8xf32>
    %38 = arith.mulf %36, %37 : vector<2x1x8xf32>
    %39 = vector.shape_cast %38 : vector<2x1x8xf32> to vector<2x1x1x8xf32>
    %40 = vector.shape_cast %39 : vector<2x1x1x8xf32> to vector<2x1x1x8xf32>
    %41 = vector.broadcast %40 : vector<2x1x1x8xf32> to vector<2x4x1x8xf32>
    %42 = vector.shape_cast %41 : vector<2x4x1x8xf32> to vector<8x1x8xf32>
    %c0_18 = arith.constant 0 : index
    %c0_19 = arith.constant 0 : index
    %c0_20 = arith.constant 0 : index
    %43 = vector.load %arg11[%c0_18, %c0_19, %c0_20] : memref<2x6x32xf32, #tpu.memory_space<vmem>>, vector<1x6x32xf32>
    %44 = vector.shape_cast %43 : vector<1x6x32xf32> to vector<6x32xf32>
    %45 = vector.extract_strided_slice %44 {offsets = [0, 0], sizes = [1, 32], strides = [1, 1]} : vector<6x32xf32> to vector<1x32xf32>
    %46 = vector.extract_strided_slice %44 {offsets = [1, 0], sizes = [1, 32], strides = [1, 1]} : vector<6x32xf32> to vector<1x32xf32>
    %47 = vector.extract_strided_slice %44 {offsets = [2, 0], sizes = [1, 32], strides = [1, 1]} : vector<6x32xf32> to vector<1x32xf32>
    %48 = vector.extract_strided_slice %44 {offsets = [3, 0], sizes = [1, 32], strides = [1, 1]} : vector<6x32xf32> to vector<1x32xf32>
    %49 = vector.extract_strided_slice %44 {offsets = [4, 0], sizes = [1, 32], strides = [1, 1]} : vector<6x32xf32> to vector<1x32xf32>
    %50 = vector.extract_strided_slice %44 {offsets = [5, 0], sizes = [1, 32], strides = [1, 1]} : vector<6x32xf32> to vector<1x32xf32>
    %51 = vector.shape_cast %33 : vector<16x32xf32> to vector<2x1x8x32xf32>
    %52 = vector.shape_cast %51 : vector<2x1x8x32xf32> to vector<2x1x8x32xf32>
    %53 = vector.broadcast %52 : vector<2x1x8x32xf32> to vector<2x4x8x32xf32>
    %54 = vector.shape_cast %53 : vector<2x4x8x32xf32> to vector<8x8x32xf32>
    %55 = arith.truncf %54 : vector<8x8x32xf32> to vector<8x8x32xbf16>
    %c0_21 = arith.constant 0 : index
    %c0_22 = arith.constant 0 : index
    %c0_23 = arith.constant 0 : index
    %c0_24 = arith.constant 0 : index
    %56 = vector.load %arg5[%c0_21, %c0_22, %c0_23, %c0_24] : memref<2x8x32x24xbf16, #tpu.memory_space<vmem>>, vector<1x8x32x24xbf16>
    %57 = vector.shape_cast %56 : vector<1x8x32x24xbf16> to vector<8x32x24xbf16>
    "tpu.trace_start"() <{level = 10 : i32, message = "zsh,zhk->zsk"}> : () -> ()
    %cst_25 = arith.constant dense<0.000000e+00> : vector<8x8x24xf32>
    %58 = tpu.matmul %55, %57, %cst_25 {dimension_numbers = #tpu.dot_dimension_numbers<[2], [1], [1], [2], [0, 0, 0, 1, 1, 2], [0], [0]>} : vector<8x8x32xbf16>, vector<8x32x24xbf16>, vector<8x8x24xf32> -> vector<8x8x24xf32>
    "tpu.trace_stop"() : () -> ()
    %c0_26 = arith.constant 0 : index
    %c0_27 = arith.constant 0 : index
    %c0_28 = arith.constant 0 : index
    %c0_29 = arith.constant 0 : index
    %59 = vector.load %arg6[%c0_26, %c0_27, %c0_28, %c0_29] : memref<2x8x1x24xf32, #tpu.memory_space<vmem>>, vector<1x8x1x24xf32>
    %60 = vector.shape_cast %59 : vector<1x8x1x24xf32> to vector<8x1x24xf32>
    %61 = vector.broadcast %60 : vector<8x1x24xf32> to vector<8x8x24xf32>
    %62 = arith.addf %58, %61 : vector<8x8x24xf32>
    %63 = vector.extract_strided_slice %62 {offsets = [0, 0, 0], sizes = [8, 8, 8], strides = [1, 1, 1]} : vector<8x8x24xf32> to vector<8x8x8xf32>
    %64 = arith.truncf %63 : vector<8x8x8xf32> to vector<8x8x8xbf16>
    %65 = vector.extract_strided_slice %62 {offsets = [0, 0, 8], sizes = [8, 8, 8], strides = [1, 1, 1]} : vector<8x8x24xf32> to vector<8x8x8xf32>
    %66 = arith.truncf %65 : vector<8x8x8xf32> to vector<8x8x8xbf16>
    %67 = vector.extract_strided_slice %62 {offsets = [0, 0, 16], sizes = [8, 8, 8], strides = [1, 1, 1]} : vector<8x8x24xf32> to vector<8x8x8xf32>
    %68 = arith.truncf %67 : vector<8x8x8xf32> to vector<8x8x8xbf16>
    "tpu.trace_start"() <{level = 10 : i32, message = "zqd,zkd->zqk"}> : () -> ()
    %cst_30 = arith.constant dense<0.000000e+00> : vector<8x8x8xf32>
    %69 = tpu.matmul %64, %66, %cst_30 {dimension_numbers = #tpu.dot_dimension_numbers<[2], [2], [1], [1], [0, 0, 0, 1, 1, 1], [0], [0]>} : vector<8x8x8xbf16>, vector<8x8x8xbf16>, vector<8x8x8xf32> -> vector<8x8x8xf32>
    "tpu.trace_stop"() : () -> ()
    %70 = vector.broadcast %42 : vector<8x1x8xf32> to vector<8x8x8xf32>
    %71 = arith.addf %69, %70 : vector<8x8x8xf32>
    %cst_31 = arith.constant dense<0xFF800000> : vector<8x8xf32>
    %72 = vector.multi_reduction <maximumf>, %71, %cst_31 [2] : vector<8x8x8xf32> to vector<8x8xf32>
    %73 = vector.shape_cast %72 : vector<8x8xf32> to vector<8x8x1xf32>
    %74 = vector.broadcast %73 : vector<8x8x1xf32> to vector<8x8x8xf32>
    %75 = arith.subf %71, %74 : vector<8x8x8xf32>
    %76 = math.exp %75 : vector<8x8x8xf32>
    %cst_32 = arith.constant dense<0.000000e+00> : vector<8x8xf32>
    %77 = vector.multi_reduction <add>, %76, %cst_32 [2] : vector<8x8x8xf32> to vector<8x8xf32>
    %78 = vector.shape_cast %77 : vector<8x8xf32> to vector<8x8x1xf32>
    %79 = tpu.reciprocal %78 {approx = true} : vector<8x8x1xf32> -> vector<8x8x1xf32>
    %80 = vector.broadcast %79 : vector<8x8x1xf32> to vector<8x8x8xf32>
    %81 = arith.mulf %76, %80 : vector<8x8x8xf32>
    %82 = arith.truncf %81 : vector<8x8x8xf32> to vector<8x8x8xbf16>
    "tpu.trace_start"() <{level = 10 : i32, message = "zqk,zkd->zqd"}> : () -> ()
    %cst_33 = arith.constant dense<0.000000e+00> : vector<8x8x8xf32>
    %83 = tpu.matmul %82, %68, %cst_33 {dimension_numbers = #tpu.dot_dimension_numbers<[2], [1], [1], [2], [0, 0, 0, 1, 1, 2], [0], [0]>} : vector<8x8x8xbf16>, vector<8x8x8xbf16>, vector<8x8x8xf32> -> vector<8x8x8xf32>
    "tpu.trace_stop"() : () -> ()
    %84 = arith.truncf %83 : vector<8x8x8xf32> to vector<8x8x8xbf16>
    %c0_34 = arith.constant 0 : index
    %c0_35 = arith.constant 0 : index
    %c0_36 = arith.constant 0 : index
    %c0_37 = arith.constant 0 : index
    %85 = vector.load %arg7[%c0_34, %c0_35, %c0_36, %c0_37] : memref<2x8x8x32xbf16, #tpu.memory_space<vmem>>, vector<1x8x8x32xbf16>
    %86 = vector.shape_cast %85 : vector<1x8x8x32xbf16> to vector<8x8x32xbf16>
    "tpu.trace_start"() <{level = 10 : i32, message = "zsd,zdh->zsh"}> : () -> ()
    %cst_38 = arith.constant dense<0.000000e+00> : vector<8x8x32xf32>
    %87 = tpu.matmul %84, %86, %cst_38 {dimension_numbers = #tpu.dot_dimension_numbers<[2], [1], [1], [2], [0, 0, 0, 1, 1, 2], [0], [0]>} : vector<8x8x8xbf16>, vector<8x8x32xbf16>, vector<8x8x32xf32> -> vector<8x8x32xf32>
    "tpu.trace_stop"() : () -> ()
    %88 = vector.shape_cast %87 : vector<8x8x32xf32> to vector<2x4x8x32xf32>
    %cst_39 = arith.constant dense<0.000000e+00> : vector<2x8x32xf32>
    %89 = vector.multi_reduction <add>, %88, %cst_39 [1] : vector<2x4x8x32xf32> to vector<2x8x32xf32>
    %90 = vector.shape_cast %89 : vector<2x8x32xf32> to vector<16x32xf32>
    %91 = vector.broadcast %45 : vector<1x32xf32> to vector<16x32xf32>
    %92 = arith.addf %90, %91 : vector<16x32xf32>
    %93 = arith.addf %33, %92 : vector<16x32xf32>
    %cst_40 = arith.constant dense<0.000000e+00> : vector<16xf32>
    %94 = vector.multi_reduction <add>, %93, %cst_40 [1] : vector<16x32xf32> to vector<16xf32>
    %95 = vector.shape_cast %94 : vector<16xf32> to vector<16x1xf32>
    %cst_41 = arith.constant 3.200000e+01 : f32
    %96 = vector.broadcast %cst_41 : f32 to vector<16x1xf32>
    %97 = arith.divf %95, %96 : vector<16x1xf32>
    %98 = vector.broadcast %97 : vector<16x1xf32> to vector<16x32xf32>
    %99 = arith.subf %93, %98 : vector<16x32xf32>
    %100 = arith.mulf %99, %99 : vector<16x32xf32>
    %cst_42 = arith.constant dense<0.000000e+00> : vector<16xf32>
    %101 = vector.multi_reduction <add>, %100, %cst_42 [1] : vector<16x32xf32> to vector<16xf32>
    %102 = vector.shape_cast %101 : vector<16xf32> to vector<16x1xf32>
    %cst_43 = arith.constant 3.200000e+01 : f32
    %103 = vector.broadcast %cst_43 : f32 to vector<16x1xf32>
    %104 = arith.divf %102, %103 : vector<16x1xf32>
    %105 = vector.broadcast %97 : vector<16x1xf32> to vector<16x32xf32>
    %106 = arith.subf %93, %105 : vector<16x32xf32>
    %cst_44 = arith.constant 9.99999996E-13 : f32
    %107 = vector.broadcast %cst_44 : f32 to vector<16x1xf32>
    %108 = arith.addf %104, %107 : vector<16x1xf32>
    %109 = math.rsqrt %108 : vector<16x1xf32>
    %110 = vector.broadcast %109 : vector<16x1xf32> to vector<16x32xf32>
    %111 = arith.mulf %106, %110 : vector<16x32xf32>
    %112 = vector.broadcast %46 : vector<1x32xf32> to vector<16x32xf32>
    %113 = arith.mulf %111, %112 : vector<16x32xf32>
    %114 = vector.broadcast %47 : vector<1x32xf32> to vector<16x32xf32>
    %115 = arith.addf %113, %114 : vector<16x32xf32>
    %116 = arith.truncf %115 : vector<16x32xf32> to vector<16x32xbf16>
    %c0_45 = arith.constant 0 : index
    %c0_46 = arith.constant 0 : index
    %c0_47 = arith.constant 0 : index
    %117 = vector.load %arg8[%c0_45, %c0_46, %c0_47] : memref<2x32x64xbf16, #tpu.memory_space<vmem>>, vector<1x32x64xbf16>
    %118 = vector.shape_cast %117 : vector<1x32x64xbf16> to vector<32x64xbf16>
    %cst_48 = arith.constant dense<0.000000e+00> : vector<16x64xf32>
    %119 = tpu.matmul %116, %118, %cst_48 {dimension_numbers = #tpu.dot_dimension_numbers<[1], [0], [0], [1], [0, 0, 1, 1], [], []>} : vector<16x32xbf16>, vector<32x64xbf16>, vector<16x64xf32> -> vector<16x64xf32>
    %c0_49 = arith.constant 0 : index
    %c0_50 = arith.constant 0 : index
    %c0_51 = arith.constant 0 : index
    %120 = vector.load %arg9[%c0_49, %c0_50, %c0_51] : memref<2x1x64xf32, #tpu.memory_space<vmem>>, vector<1x1x64xf32>
    %121 = vector.shape_cast %120 : vector<1x1x64xf32> to vector<1x64xf32>
    %122 = vector.broadcast %121 : vector<1x64xf32> to vector<16x64xf32>
    %123 = arith.addf %119, %122 : vector<16x64xf32>
    %124 = arith.mulf %123, %123 : vector<16x64xf32>
    %125 = arith.mulf %123, %124 : vector<16x64xf32>
    %cst_52 = arith.constant 4.471500e-02 : f32
    %126 = vector.broadcast %cst_52 : f32 to vector<16x64xf32>
    %127 = arith.mulf %126, %125 : vector<16x64xf32>
    %128 = arith.addf %123, %127 : vector<16x64xf32>
    %cst_53 = arith.constant 0.797884583 : f32
    %129 = vector.broadcast %cst_53 : f32 to vector<16x64xf32>
    %130 = arith.mulf %129, %128 : vector<16x64xf32>
    %131 = math.tanh %130 : vector<16x64xf32>
    %cst_54 = arith.constant 1.000000e+00 : f32
    %132 = vector.broadcast %cst_54 : f32 to vector<16x64xf32>
    %133 = arith.addf %132, %131 : vector<16x64xf32>
    %cst_55 = arith.constant 5.000000e-01 : f32
    %134 = vector.broadcast %cst_55 : f32 to vector<16x64xf32>
    %135 = arith.mulf %134, %133 : vector<16x64xf32>
    %136 = arith.mulf %123, %135 : vector<16x64xf32>
    %137 = arith.truncf %136 : vector<16x64xf32> to vector<16x64xbf16>
    %c0_56 = arith.constant 0 : index
    %c0_57 = arith.constant 0 : index
    %c0_58 = arith.constant 0 : index
    %138 = vector.load %arg10[%c0_56, %c0_57, %c0_58] : memref<2x64x32xbf16, #tpu.memory_space<vmem>>, vector<1x64x32xbf16>
    %139 = vector.shape_cast %138 : vector<1x64x32xbf16> to vector<64x32xbf16>
    %cst_59 = arith.constant dense<0.000000e+00> : vector<16x32xf32>
    %140 = tpu.matmul %137, %139, %cst_59 {dimension_numbers = #tpu.dot_dimension_numbers<[1], [0], [0], [1], [0, 0, 1, 1], [], []>} : vector<16x64xbf16>, vector<64x32xbf16>, vector<16x32xf32> -> vector<16x32xf32>
    %141 = vector.broadcast %48 : vector<1x32xf32> to vector<16x32xf32>
    %142 = arith.addf %140, %141 : vector<16x32xf32>
    %143 = arith.addf %115, %142 : vector<16x32xf32>
    %cst_60 = arith.constant dense<0.000000e+00> : vector<16xf32>
    %144 = vector.multi_reduction <add>, %143, %cst_60 [1] : vector<16x32xf32> to vector<16xf32>
    %145 = vector.shape_cast %144 : vector<16xf32> to vector<16x1xf32>
    %cst_61 = arith.constant 3.200000e+01 : f32
    %146 = vector.broadcast %cst_61 : f32 to vector<16x1xf32>
    %147 = arith.divf %145, %146 : vector<16x1xf32>
    %148 = vector.broadcast %147 : vector<16x1xf32> to vector<16x32xf32>
    %149 = arith.subf %143, %148 : vector<16x32xf32>
    %150 = arith.mulf %149, %149 : vector<16x32xf32>
    %cst_62 = arith.constant dense<0.000000e+00> : vector<16xf32>
    %151 = vector.multi_reduction <add>, %150, %cst_62 [1] : vector<16x32xf32> to vector<16xf32>
    %152 = vector.shape_cast %151 : vector<16xf32> to vector<16x1xf32>
    %cst_63 = arith.constant 3.200000e+01 : f32
    %153 = vector.broadcast %cst_63 : f32 to vector<16x1xf32>
    %154 = arith.divf %152, %153 : vector<16x1xf32>
    %155 = vector.broadcast %147 : vector<16x1xf32> to vector<16x32xf32>
    %156 = arith.subf %143, %155 : vector<16x32xf32>
    %cst_64 = arith.constant 9.99999996E-13 : f32
    %157 = vector.broadcast %cst_64 : f32 to vector<16x1xf32>
    %158 = arith.addf %154, %157 : vector<16x1xf32>
    %159 = math.rsqrt %158 : vector<16x1xf32>
    %160 = vector.broadcast %159 : vector<16x1xf32> to vector<16x32xf32>
    %161 = arith.mulf %156, %160 : vector<16x32xf32>
    %162 = vector.broadcast %49 : vector<1x32xf32> to vector<16x32xf32>
    %163 = arith.mulf %161, %162 : vector<16x32xf32>
    %164 = vector.broadcast %50 : vector<1x32xf32> to vector<16x32xf32>
    %165 = arith.addf %163, %164 : vector<16x32xf32>
    %c1_65 = arith.constant 1 : index
    %c0_66 = arith.constant 0 : index
    %c0_67 = arith.constant 0 : index
    %166 = vector.load %arg11[%c1_65, %c0_66, %c0_67] : memref<2x6x32xf32, #tpu.memory_space<vmem>>, vector<1x6x32xf32>
    %167 = vector.shape_cast %166 : vector<1x6x32xf32> to vector<6x32xf32>
    %168 = vector.extract_strided_slice %167 {offsets = [0, 0], sizes = [1, 32], strides = [1, 1]} : vector<6x32xf32> to vector<1x32xf32>
    %169 = vector.extract_strided_slice %167 {offsets = [1, 0], sizes = [1, 32], strides = [1, 1]} : vector<6x32xf32> to vector<1x32xf32>
    %170 = vector.extract_strided_slice %167 {offsets = [2, 0], sizes = [1, 32], strides = [1, 1]} : vector<6x32xf32> to vector<1x32xf32>
    %171 = vector.extract_strided_slice %167 {offsets = [3, 0], sizes = [1, 32], strides = [1, 1]} : vector<6x32xf32> to vector<1x32xf32>
    %172 = vector.extract_strided_slice %167 {offsets = [4, 0], sizes = [1, 32], strides = [1, 1]} : vector<6x32xf32> to vector<1x32xf32>
    %173 = vector.extract_strided_slice %167 {offsets = [5, 0], sizes = [1, 32], strides = [1, 1]} : vector<6x32xf32> to vector<1x32xf32>
    %174 = vector.shape_cast %165 : vector<16x32xf32> to vector<2x1x8x32xf32>
    %175 = vector.shape_cast %174 : vector<2x1x8x32xf32> to vector<2x1x8x32xf32>
    %176 = vector.broadcast %175 : vector<2x1x8x32xf32> to vector<2x4x8x32xf32>
    %177 = vector.shape_cast %176 : vector<2x4x8x32xf32> to vector<8x8x32xf32>
    %178 = arith.truncf %177 : vector<8x8x32xf32> to vector<8x8x32xbf16>
    %c1_68 = arith.constant 1 : index
    %c0_69 = arith.constant 0 : index
    %c0_70 = arith.constant 0 : index
    %c0_71 = arith.constant 0 : index
    %179 = vector.load %arg5[%c1_68, %c0_69, %c0_70, %c0_71] : memref<2x8x32x24xbf16, #tpu.memory_space<vmem>>, vector<1x8x32x24xbf16>
    %180 = vector.shape_cast %179 : vector<1x8x32x24xbf16> to vector<8x32x24xbf16>
    "tpu.trace_start"() <{level = 10 : i32, message = "zsh,zhk->zsk"}> : () -> ()
    %cst_72 = arith.constant dense<0.000000e+00> : vector<8x8x24xf32>
    %181 = tpu.matmul %178, %180, %cst_72 {dimension_numbers = #tpu.dot_dimension_numbers<[2], [1], [1], [2], [0, 0, 0, 1, 1, 2], [0], [0]>} : vector<8x8x32xbf16>, vector<8x32x24xbf16>, vector<8x8x24xf32> -> vector<8x8x24xf32>
    "tpu.trace_stop"() : () -> ()
    %c1_73 = arith.constant 1 : index
    %c0_74 = arith.constant 0 : index
    %c0_75 = arith.constant 0 : index
    %c0_76 = arith.constant 0 : index
    %182 = vector.load %arg6[%c1_73, %c0_74, %c0_75, %c0_76] : memref<2x8x1x24xf32, #tpu.memory_space<vmem>>, vector<1x8x1x24xf32>
    %183 = vector.shape_cast %182 : vector<1x8x1x24xf32> to vector<8x1x24xf32>
    %184 = vector.broadcast %183 : vector<8x1x24xf32> to vector<8x8x24xf32>
    %185 = arith.addf %181, %184 : vector<8x8x24xf32>
    %186 = vector.extract_strided_slice %185 {offsets = [0, 0, 0], sizes = [8, 8, 8], strides = [1, 1, 1]} : vector<8x8x24xf32> to vector<8x8x8xf32>
    %187 = arith.truncf %186 : vector<8x8x8xf32> to vector<8x8x8xbf16>
    %188 = vector.extract_strided_slice %185 {offsets = [0, 0, 8], sizes = [8, 8, 8], strides = [1, 1, 1]} : vector<8x8x24xf32> to vector<8x8x8xf32>
    %189 = arith.truncf %188 : vector<8x8x8xf32> to vector<8x8x8xbf16>
    %190 = vector.extract_strided_slice %185 {offsets = [0, 0, 16], sizes = [8, 8, 8], strides = [1, 1, 1]} : vector<8x8x24xf32> to vector<8x8x8xf32>
    %191 = arith.truncf %190 : vector<8x8x8xf32> to vector<8x8x8xbf16>
    "tpu.trace_start"() <{level = 10 : i32, message = "zqd,zkd->zqk"}> : () -> ()
    %cst_77 = arith.constant dense<0.000000e+00> : vector<8x8x8xf32>
    %192 = tpu.matmul %187, %189, %cst_77 {dimension_numbers = #tpu.dot_dimension_numbers<[2], [2], [1], [1], [0, 0, 0, 1, 1, 1], [0], [0]>} : vector<8x8x8xbf16>, vector<8x8x8xbf16>, vector<8x8x8xf32> -> vector<8x8x8xf32>
    "tpu.trace_stop"() : () -> ()
    %193 = vector.broadcast %42 : vector<8x1x8xf32> to vector<8x8x8xf32>
    %194 = arith.addf %192, %193 : vector<8x8x8xf32>
    %cst_78 = arith.constant dense<0xFF800000> : vector<8x8xf32>
    %195 = vector.multi_reduction <maximumf>, %194, %cst_78 [2] : vector<8x8x8xf32> to vector<8x8xf32>
    %196 = vector.shape_cast %195 : vector<8x8xf32> to vector<8x8x1xf32>
    %197 = vector.broadcast %196 : vector<8x8x1xf32> to vector<8x8x8xf32>
    %198 = arith.subf %194, %197 : vector<8x8x8xf32>
    %199 = math.exp %198 : vector<8x8x8xf32>
    %cst_79 = arith.constant dense<0.000000e+00> : vector<8x8xf32>
    %200 = vector.multi_reduction <add>, %199, %cst_79 [2] : vector<8x8x8xf32> to vector<8x8xf32>
    %201 = vector.shape_cast %200 : vector<8x8xf32> to vector<8x8x1xf32>
    %202 = tpu.reciprocal %201 {approx = true} : vector<8x8x1xf32> -> vector<8x8x1xf32>
    %203 = vector.broadcast %202 : vector<8x8x1xf32> to vector<8x8x8xf32>
    %204 = arith.mulf %199, %203 : vector<8x8x8xf32>
    %205 = arith.truncf %204 : vector<8x8x8xf32> to vector<8x8x8xbf16>
    "tpu.trace_start"() <{level = 10 : i32, message = "zqk,zkd->zqd"}> : () -> ()
    %cst_80 = arith.constant dense<0.000000e+00> : vector<8x8x8xf32>
    %206 = tpu.matmul %205, %191, %cst_80 {dimension_numbers = #tpu.dot_dimension_numbers<[2], [1], [1], [2], [0, 0, 0, 1, 1, 2], [0], [0]>} : vector<8x8x8xbf16>, vector<8x8x8xbf16>, vector<8x8x8xf32> -> vector<8x8x8xf32>
    "tpu.trace_stop"() : () -> ()
    %207 = arith.truncf %206 : vector<8x8x8xf32> to vector<8x8x8xbf16>
    %c1_81 = arith.constant 1 : index
    %c0_82 = arith.constant 0 : index
    %c0_83 = arith.constant 0 : index
    %c0_84 = arith.constant 0 : index
    %208 = vector.load %arg7[%c1_81, %c0_82, %c0_83, %c0_84] : memref<2x8x8x32xbf16, #tpu.memory_space<vmem>>, vector<1x8x8x32xbf16>
    %209 = vector.shape_cast %208 : vector<1x8x8x32xbf16> to vector<8x8x32xbf16>
    "tpu.trace_start"() <{level = 10 : i32, message = "zsd,zdh->zsh"}> : () -> ()
    %cst_85 = arith.constant dense<0.000000e+00> : vector<8x8x32xf32>
    %210 = tpu.matmul %207, %209, %cst_85 {dimension_numbers = #tpu.dot_dimension_numbers<[2], [1], [1], [2], [0, 0, 0, 1, 1, 2], [0], [0]>} : vector<8x8x8xbf16>, vector<8x8x32xbf16>, vector<8x8x32xf32> -> vector<8x8x32xf32>
    "tpu.trace_stop"() : () -> ()
    %211 = vector.shape_cast %210 : vector<8x8x32xf32> to vector<2x4x8x32xf32>
    %cst_86 = arith.constant dense<0.000000e+00> : vector<2x8x32xf32>
    %212 = vector.multi_reduction <add>, %211, %cst_86 [1] : vector<2x4x8x32xf32> to vector<2x8x32xf32>
    %213 = vector.shape_cast %212 : vector<2x8x32xf32> to vector<16x32xf32>
    %214 = vector.broadcast %168 : vector<1x32xf32> to vector<16x32xf32>
    %215 = arith.addf %213, %214 : vector<16x32xf32>
    %216 = arith.addf %165, %215 : vector<16x32xf32>
    %cst_87 = arith.constant dense<0.000000e+00> : vector<16xf32>
    %217 = vector.multi_reduction <add>, %216, %cst_87 [1] : vector<16x32xf32> to vector<16xf32>
    %218 = vector.shape_cast %217 : vector<16xf32> to vector<16x1xf32>
    %cst_88 = arith.constant 3.200000e+01 : f32
    %219 = vector.broadcast %cst_88 : f32 to vector<16x1xf32>
    %220 = arith.divf %218, %219 : vector<16x1xf32>
    %221 = vector.broadcast %220 : vector<16x1xf32> to vector<16x32xf32>
    %222 = arith.subf %216, %221 : vector<16x32xf32>
    %223 = arith.mulf %222, %222 : vector<16x32xf32>
    %cst_89 = arith.constant dense<0.000000e+00> : vector<16xf32>
    %224 = vector.multi_reduction <add>, %223, %cst_89 [1] : vector<16x32xf32> to vector<16xf32>
    %225 = vector.shape_cast %224 : vector<16xf32> to vector<16x1xf32>
    %cst_90 = arith.constant 3.200000e+01 : f32
    %226 = vector.broadcast %cst_90 : f32 to vector<16x1xf32>
    %227 = arith.divf %225, %226 : vector<16x1xf32>
    %228 = vector.broadcast %220 : vector<16x1xf32> to vector<16x32xf32>
    %229 = arith.subf %216, %228 : vector<16x32xf32>
    %cst_91 = arith.constant 9.99999996E-13 : f32
    %230 = vector.broadcast %cst_91 : f32 to vector<16x1xf32>
    %231 = arith.addf %227, %230 : vector<16x1xf32>
    %232 = math.rsqrt %231 : vector<16x1xf32>
    %233 = vector.broadcast %232 : vector<16x1xf32> to vector<16x32xf32>
    %234 = arith.mulf %229, %233 : vector<16x32xf32>
    %235 = vector.broadcast %169 : vector<1x32xf32> to vector<16x32xf32>
    %236 = arith.mulf %234, %235 : vector<16x32xf32>
    %237 = vector.broadcast %170 : vector<1x32xf32> to vector<16x32xf32>
    %238 = arith.addf %236, %237 : vector<16x32xf32>
    %239 = arith.truncf %238 : vector<16x32xf32> to vector<16x32xbf16>
    %c1_92 = arith.constant 1 : index
    %c0_93 = arith.constant 0 : index
    %c0_94 = arith.constant 0 : index
    %240 = vector.load %arg8[%c1_92, %c0_93, %c0_94] : memref<2x32x64xbf16, #tpu.memory_space<vmem>>, vector<1x32x64xbf16>
    %241 = vector.shape_cast %240 : vector<1x32x64xbf16> to vector<32x64xbf16>
    %cst_95 = arith.constant dense<0.000000e+00> : vector<16x64xf32>
    %242 = tpu.matmul %239, %241, %cst_95 {dimension_numbers = #tpu.dot_dimension_numbers<[1], [0], [0], [1], [0, 0, 1, 1], [], []>} : vector<16x32xbf16>, vector<32x64xbf16>, vector<16x64xf32> -> vector<16x64xf32>
    %c1_96 = arith.constant 1 : index
    %c0_97 = arith.constant 0 : index
    %c0_98 = arith.constant 0 : index
    %243 = vector.load %arg9[%c1_96, %c0_97, %c0_98] : memref<2x1x64xf32, #tpu.memory_space<vmem>>, vector<1x1x64xf32>
    %244 = vector.shape_cast %243 : vector<1x1x64xf32> to vector<1x64xf32>
    %245 = vector.broadcast %244 : vector<1x64xf32> to vector<16x64xf32>
    %246 = arith.addf %242, %245 : vector<16x64xf32>
    %247 = arith.mulf %246, %246 : vector<16x64xf32>
    %248 = arith.mulf %246, %247 : vector<16x64xf32>
    %cst_99 = arith.constant 4.471500e-02 : f32
    %249 = vector.broadcast %cst_99 : f32 to vector<16x64xf32>
    %250 = arith.mulf %249, %248 : vector<16x64xf32>
    %251 = arith.addf %246, %250 : vector<16x64xf32>
    %cst_100 = arith.constant 0.797884583 : f32
    %252 = vector.broadcast %cst_100 : f32 to vector<16x64xf32>
    %253 = arith.mulf %252, %251 : vector<16x64xf32>
    %254 = math.tanh %253 : vector<16x64xf32>
    %cst_101 = arith.constant 1.000000e+00 : f32
    %255 = vector.broadcast %cst_101 : f32 to vector<16x64xf32>
    %256 = arith.addf %255, %254 : vector<16x64xf32>
    %cst_102 = arith.constant 5.000000e-01 : f32
    %257 = vector.broadcast %cst_102 : f32 to vector<16x64xf32>
    %258 = arith.mulf %257, %256 : vector<16x64xf32>
    %259 = arith.mulf %246, %258 : vector<16x64xf32>
    %260 = arith.truncf %259 : vector<16x64xf32> to vector<16x64xbf16>
    %c1_103 = arith.constant 1 : index
    %c0_104 = arith.constant 0 : index
    %c0_105 = arith.constant 0 : index
    %261 = vector.load %arg10[%c1_103, %c0_104, %c0_105] : memref<2x64x32xbf16, #tpu.memory_space<vmem>>, vector<1x64x32xbf16>
    %262 = vector.shape_cast %261 : vector<1x64x32xbf16> to vector<64x32xbf16>
    %cst_106 = arith.constant dense<0.000000e+00> : vector<16x32xf32>
    %263 = tpu.matmul %260, %262, %cst_106 {dimension_numbers = #tpu.dot_dimension_numbers<[1], [0], [0], [1], [0, 0, 1, 1], [], []>} : vector<16x64xbf16>, vector<64x32xbf16>, vector<16x32xf32> -> vector<16x32xf32>
    %264 = vector.broadcast %171 : vector<1x32xf32> to vector<16x32xf32>
    %265 = arith.addf %263, %264 : vector<16x32xf32>
    %266 = arith.addf %238, %265 : vector<16x32xf32>
    %cst_107 = arith.constant dense<0.000000e+00> : vector<16xf32>
    %267 = vector.multi_reduction <add>, %266, %cst_107 [1] : vector<16x32xf32> to vector<16xf32>
    %268 = vector.shape_cast %267 : vector<16xf32> to vector<16x1xf32>
    %cst_108 = arith.constant 3.200000e+01 : f32
    %269 = vector.broadcast %cst_108 : f32 to vector<16x1xf32>
    %270 = arith.divf %268, %269 : vector<16x1xf32>
    %271 = vector.broadcast %270 : vector<16x1xf32> to vector<16x32xf32>
    %272 = arith.subf %266, %271 : vector<16x32xf32>
    %273 = arith.mulf %272, %272 : vector<16x32xf32>
    %cst_109 = arith.constant dense<0.000000e+00> : vector<16xf32>
    %274 = vector.multi_reduction <add>, %273, %cst_109 [1] : vector<16x32xf32> to vector<16xf32>
    %275 = vector.shape_cast %274 : vector<16xf32> to vector<16x1xf32>
    %cst_110 = arith.constant 3.200000e+01 : f32
    %276 = vector.broadcast %cst_110 : f32 to vector<16x1xf32>
    %277 = arith.divf %275, %276 : vector<16x1xf32>
    %278 = vector.broadcast %270 : vector<16x1xf32> to vector<16x32xf32>
    %279 = arith.subf %266, %278 : vector<16x32xf32>
    %cst_111 = arith.constant 9.99999996E-13 : f32
    %280 = vector.broadcast %cst_111 : f32 to vector<16x1xf32>
    %281 = arith.addf %277, %280 : vector<16x1xf32>
    %282 = math.rsqrt %281 : vector<16x1xf32>
    %283 = vector.broadcast %282 : vector<16x1xf32> to vector<16x32xf32>
    %284 = arith.mulf %279, %283 : vector<16x32xf32>
    %285 = vector.broadcast %172 : vector<1x32xf32> to vector<16x32xf32>
    %286 = arith.mulf %284, %285 : vector<16x32xf32>
    %287 = vector.broadcast %173 : vector<1x32xf32> to vector<16x32xf32>
    %288 = arith.addf %286, %287 : vector<16x32xf32>
    %c0_112 = arith.constant 0 : index
    %c0_113 = arith.constant 0 : index
    %289 = vector.load %arg12[%c0_112, %c0_113] : memref<16x32xf32, #tpu.memory_space<vmem>>, vector<16x32xf32>
    tpu.vector_store %arg12[%c0_112, %c0_113], %288 {strides = array<i32>} : memref<16x32xf32, #tpu.memory_space<vmem>>, vector<16x32xf32>,
    return
  }
}

</mosaic_0001>

<bundles_post_ra>
// kernel: fused_transformer.1
= control target key start
LH: loop header
LB: loop body
LE: loop exit
PB: predicated region body
PF: predicated region fallthrough
CT: control target
= control target key end

     0   :  { %v5354_v2 = vmov 0   ;;  %v5355_v11 = vmov 0.0   ;;  %s6399_s0 = inlined_call_operand.vmem [shape: s32[16,1], index: 0, kind: input, shape index: {}]   ;;  %s6400_s1 = inlined_call_operand.vmem [shape: f32[2,1,8], index: 1, kind: input, shape index: {}]   ;;  %s6401_s2 = inlined_call_operand.vmem [shape: f32[64,32], index: 2, kind: input, shape index: {}]   ;;  %s6402_s3 = inlined_call_operand.vmem [shape: f32[16,32], index: 3, kind: input, shape index: {}]   ;;  %s6403_s4 = inlined_call_operand.vmem [shape: f32[2,32], index: 4, kind: input, shape index: {}]   ;;  %s6404_s5 = inlined_call_operand.vmem [shape: bf16[2,8,32,24], index: 5, kind: input, shape index: {}]   ;;  %s6405_s6 = inlined_call_operand.vmem [shape: f32[2,8,1,24], index: 6, kind: input, shape index: {}]   ;;  %s6406_s7 = inlined_call_operand.vmem [shape: bf16[2,8,8,32], index: 7, kind: input, shape index: {}]   ;;  %s6407_s8 = inlined_call_operand.vmem [shape: bf16[2,32,64], index: 8, kind: input, shape index: {}]   ;;  %s6408_s9 = inlined_call_operand.vmem [shape: f32[2,1,64], index: 9, kind: input, shape index: {}]   ;;  %s6409_s10 = inlined_call_operand.vmem [shape: bf16[2,64,32], index: 10, kind: input, shape index: {}]   ;;  %s6410_s11 = inlined_call_operand.vmem [shape: f32[2,6,32], index: 11, kind: input, shape index: {}]   ;;  %s6411_s12 = inlined_call_operand.hbm [shape: f32[16,32], index: 12, kind: output, shape index: {}]  }
   0x1   :  { %v43_v0 = vld [vmem:[%s6399_s0] sm:$0xff]  ;;  %5193 = vset.pattern.permute.xlu0 %v5354_v2  ;;  %v60_v3 = vld [vmem:[%s6401_s2 + $0x8] sm:$0xff]  ;;  %v61_v4 = vld [vmem:[%s6401_s2 + $0x10] sm:$0xff]  ;;  %4713 = vmatprep.subr.bf16.mxu1 %v5355_v11 }
   0x2   :  { %v59_v1 = vld [vmem:[%s6401_s2] sm:$0xff]  ;;  %v62_v5 = vld [vmem:[%s6401_s2 + $0x18] sm:$0xff]  ;;  %48 = vperm.xlu0 %5193, %v43_v0   ;;  %v44_v6 = vld [vmem:[%s6399_s0 + $0x8] sm:$0xff] }
   0x3   :  { %v5169_v7 = vpack.c.bf16 %v60_v3, %v59_v1  ;;  %v5173_v8 = vpack.c.bf16 %v62_v5, %v61_v4  ;;  %v63_v9 = vld [vmem:[%s6401_s2 + $0x20] sm:$0xff]  ;;  %v64_v10 = vld [vmem:[%s6401_s2 + $0x28] sm:$0xff]  ;;  %v65_v12 = vld [vmem:[%s6401_s2 + $0x30] sm:$0xff] }
   0x4   :  { %v66_v13 = vld [vmem:[%s6401_s2 + $0x38] sm:$0xff]  ;;  %v5177_v14 = vpack.c.bf16 %v64_v10, %v63_v9 }
   0x5   :  { %5170 = vmatprep.subr.bf16.mxu0 %v5169_v7  ;;  %v5181_v15 = vpack.c.bf16 %v66_v13, %v65_v12 }
   0x6   :  { %5172 = vmatpush3.bf16.msra.mxu0 %v5169_v7  ;;  %51 = vperm.xlu0 %5193, %v44_v6  }
   0x7   :  { %5174 = vmatprep.subr.bf16.mxu0 %v5173_v8 }
   0xa   :  { %5176 = vmatpush3.bf16.msra.mxu0 %v5173_v8 }
   0xb   :  { %5178 = vmatprep.subr.bf16.mxu0 %v5177_v14 }
   0xe   :  { %5180 = vmatpush3.bf16.msra.mxu0 %v5177_v14 }
   0xf   :  { %5182 = vmatprep.subr.bf16.mxu0 %v5181_v15 }
  0x12   :  { %5184 = vmatpush3.bf16.msra.mxu0 %v5181_v15 }
  0x13   :  { %4745 = vmatprep.subr.bf16.mxu0 %v5355_v11 }
  0x14   :  { %17 = vsyncpa [#allocation3], 0  ;;  %v45_v16 = vlaneseq  ;;  %vm69_vm0 = vcmask 523264   ;;  %v67_v22 = vld [vmem:[%s6402_s3] sm:$0xff]  ;;  %v68_v24 = vld [vmem:[%s6402_s3 + $0x8] sm:$0xff]  ;;  %vm153_vm3 = vcmask 261120  }
  0x15   :  { %v5194_v40 = vld [vmem:[%s6404_s5] sm:$0xff]   ;;  %v5195_v41 = vld [vmem:[%s6404_s5 + $0x8] sm:$0xff]   ;;  %vm5356_vm4 = vmmov 0   ;;  %v5197_v58 = vld [vmem:[%s6404_s5 + $0x10] sm:$0xff]   ;;  %s5357_s2 = smov 120   ;;  %s5358_s24 = smov 112  }
  0x16   :  { %v46_v17 = vand.u32 127, %v45_v16  ;;  %4714 = vmatpush3.bf16.msra.mxu1 %v5194_v40  ;;  %v5196_v42 = vld [vmem:[%s6404_s5 + $0x40] sm:$0xff]   ;;  %4717 = vmatprep.mubr.msk.bf16.mxu1 %vm5356_vm4, %v5355_v11  ;;  %v5198_v43 = vld [vmem:[%s6404_s5 + $0x48] sm:$0xff]   ;;  %v5199_v62 = vld [vmem:[%s6404_s5 + $0x18] sm:$0xff]   ;;  %vm735_vm5 = vcmask 64512   ;;  %vm1226_vm6 = vcmask 1043456  }
  0x17   :  { %4715 = vmatprep.subr.bf16.mxu1 %v5355_v11  ;;  %v4330_v51 = vld [vmem:[%s6403_s4] ss:$0 sm:$0xff]  ;;  %v4331_v53 = vld [vmem:[%s6403_s4 + $0x1] ss:$0 sm:$0xff]  ;;  %v5202_v2 = vld [vmem:[%s6404_s5 + $0x68] sm:$0xff]  }
  0x18   :  { %v5200_v63 = vld [vmem:[%s6404_s5 + $0x60] sm:$0xff]   ;;  %v5203_v3 = vld [vmem:[%s6404_s5 + $0x28] sm:$0xff]   ;;  %v5204_v4 = vld [vmem:[%s6404_s5 + $0x30] sm:$0xff]  }
  0x19   :  { %v5201_v1 = vld [vmem:[%s6404_s5 + $0x20] sm:$0xff]   ;;  %v5205_v5 = vld [vmem:[%s6404_s5 + $0x38] sm:$0xff]   ;;  %v5206_v6 = vld [vmem:[%s6404_s5 + $0x50] sm:$0xff]  }
  0x1a   :  { %4716 = vmatpush3.bf16.msra.mxu1 %v5195_v41  ;;  %v5207_v7 = vld [vmem:[%s6404_s5 + $0x58] sm:$0xff]   ;;  %v5208_v8 = vld [vmem:[%s6404_s5 + $0x70] sm:$0xff]   ;;  %v4332_v10 = vld [vmem:[%s6405_s6] ss:$0 sm:$0xff] }
  0x1b   :  { %4721 = vmatprep.subr.bf16.mxu1 %v5355_v11  ;;  %v5209_v9 = vld [vmem:[%s6404_s5 + $0x78] sm:$0xff]  }
  0x81   :  { %v49_v18 = vpop.permute.xlu0 %48 }
  0x82   :  { %vm53_vm1 = vcmp.eq.s32.totalorder %v46_v17, %v49_v18 }
  0x83   :  { %v4326_v19 = vsel %vm53_vm1, 1.0, %v5355_v11 }
  0x84   :  { %4710 = vmatprep.mubr.msk.f32.mxu0 %vm69_vm0, %v4326_v19 }
  0x85   :  { %v52_v20 = vpop.permute.xlu0 %51 }
  0x86   :  { %vm54_vm2 = vcmp.eq.s32.totalorder %v46_v17, %v52_v20  ;;  %v4336_v17 = vld [vmem:[%s6405_s6 + $0x4] ss:$0 sm:$0xff] }
  0x87   :  { %v4327_v21 = vsel %vm54_vm2, 1.0, %v5355_v11 }
  0x88   :  { %4711 = vmatmul.mubr.msk.f32.vlgmr.msra.gmra.mrb[0].mxu0 %vm69_vm0, %v4327_v21 }
  0x89   :  { %4746 = vmatpush3.bf16.msra.mxu0 %v5196_v42  ;;  %4749 = vmatprep.mubr.msk.bf16.mxu0 %vm5356_vm4, %v5355_v11 }
  0x8a   :  { %4747 = vmatprep.subr.bf16.mxu0 %v5355_v11 }
  0x8d   :  { %4748 = vmatpush3.bf16.msra.mxu0 %v5198_v43 }
  0x8e   :  { %4761 = vmatprep.subr.bf16.mxu0 %v5355_v11 }
 0x15b   :  { %v4712_v23 = vpop.f32.mrb[0].mxu0 }
 0x15c   :  { %v142_v25 = vpop.f32.mrb[1].mxu0  ;;  %v148_v27 = vadd.f32 %v4712_v23, %v68_v24  ;;  %v4333_v24 = vld [vmem:[%s6405_s6 + $0x1] ss:$0 sm:$0xff] }
 0x15d   :  { %v143_v26 = vadd.f32 %v142_v25, %v67_v22 }
 0x15e   :  { %v157_v29 = vsel %vm153_vm3, %v148_v27, 0.0 }
 0x15f   :  { %v154_v28 = vsel %vm153_vm3, %v143_v26, 0.0 }
 0x160   :  { %155 = vadd.xlane.f32.xlu1 %v154_v28 }
 0x164   :  { %158 = vadd.xlane.f32.xlu1 %v157_v29 }
 0x1ed   :  { %v156_v30 = vpop.xlane.xlu1 %155 }
 0x1ee   :  { %v161_v31 = vmul.f32 0.03125, %v156_v30 }
 0x1f0   :  { %v163_v32 = vsub.f32 %v143_v26, %v161_v31 }
 0x1f1   :  { %v159_v33 = vpop.xlane.xlu1 %158 }
 0x1f2   :  { %v162_v34 = vmul.f32 0.03125, %v159_v33  ;;  %v165_v35 = vmul.f32 %v163_v32, %v163_v32 }
 0x1f4   :  { %v164_v36 = vsub.f32 %v148_v27, %v162_v34  ;;  %v167_v37 = vsel %vm153_vm3, %v165_v35, 0.0 }
 0x1f5   :  { %168 = vadd.xlane.f32.xlu0 %v167_v37 }
 0x1f6   :  { %v166_v38 = vmul.f32 %v164_v36, %v164_v36 }
 0x1f8   :  { %v170_v39 = vsel %vm153_vm3, %v166_v38, 0.0 }
 0x1f9   :  { %171 = vadd.xlane.f32.xlu1 %v170_v39 }
 0x282   :  { %v169_v44 = vpop.xlane.xlu0 %168 }
 0x283   :  { %v173_v45 = vmul.f32 0.03125, %v169_v44  ;;  %v4335_v44 = vld [vmem:[%s6405_s6 + $0x3] ss:$0 sm:$0xff] }
 0x285   :  { %v175_v46 = vadd.f32 1e-12, %v173_v45 }
 0x286   :  { %v172_v47 = vpop.xlane.xlu1 %171 }
 0x287   :  { %5238 = vrsqrt.f32 %v175_v46  ;;  %v174_v48 = vmul.f32 0.03125, %v172_v47 }
 0x289   :  { %v176_v49 = vadd.f32 1e-12, %v174_v48 }
 0x28b   :  { %5240 = vrsqrt.f32 %v176_v49 }
 0x291   :  { %v5239_v50 = vpop.eup %5238 }
 0x292   :  { %v179_v52 = vmul.f32 %v5239_v50, %v163_v32 }
 0x294   :  { %v185_v54 = vmul.f32 %v4330_v51, %v179_v52  ;;  %v4338_v52 = vld [vmem:[%s6405_s6 + $0x6] ss:$0 sm:$0xff] }
 0x295   :  { %v5241_v55 = vpop.eup %5240 }
 0x296   :  { %v180_v56 = vmul.f32 %v5241_v55, %v164_v36  ;;  %v5500_v57 = vadd.f32 %v4331_v53, %v185_v54  ;;  %v4334_v36 = vld [vmem:[%s6405_s6 + $0x2] ss:$0 sm:$0xff] }
 0x298   :  { %v186_v59 = vmul.f32 %v4330_v51, %v180_v56  ;;  %v200_v60 = vpack.c.bf16 %v5500_v57, %v5500_v57  ;;  %v4337_v51 = vld [vmem:[%s6405_s6 + $0x5] ss:$0 sm:$0xff] }
 0x29a   :  { %v5507_v61 = vadd.f32 %v4331_v53, %v186_v59  ;;  %4718 = vmatmul.mubr.msk.bf16.vlgmr.msra.gmra.mrb[0].mxu1 %vm153_vm3, %v200_v60 }
 0x29b   :  { %4722 = vmatpush3.bf16.msra.mxu1 %v5197_v58  ;;  %4725 = vmatprep.mubr.msk.bf16.mxu1 %vm5356_vm4, %v5355_v11 }
 0x29c   :  { %4723 = vmatprep.subr.bf16.mxu1 %v5355_v11  ;;  %v201_v0 = vpack.c.bf16 %v5507_v61, %v5507_v61 }
 0x29e   :  { %4750 = vmatmul.mubr.msk.bf16.vlgmr.msra.gmra.mrb[4].mxu0 %vm153_vm3, %v201_v0 }
 0x29f   :  { %4724 = vmatpush3.bf16.msra.mxu1 %v5199_v62  ;;  %4762 = vmatpush3.bf16.msra.mxu0 %v5200_v63  ;;  %v4339_v62 = vld [vmem:[%s6405_s6 + $0x7] ss:$0 sm:$0xff] }
 0x2a0   :  { %4729 = vmatprep.subr.bf16.mxu1 %v5355_v11  ;;  %4763 = vmatprep.subr.bf16.mxu0 %v5355_v11 }
 0x2a1   :  { %4765 = vmatprep.mubr.msk.bf16.mxu0 %vm5356_vm4, %v5355_v11 }
 0x2a2   :  { %4726 = vmatmul.mubr.msk.bf16.vlgmr.msra.gmra.mrb[4].mxu1 %vm153_vm3, %v200_v60 }
 0x2a3   :  { %4730 = vmatpush3.bf16.msra.mxu1 %v5201_v1  ;;  %4764 = vmatpush3.bf16.msra.mxu0 %v5202_v2 }
 0x2a4   :  { %4731 = vmatprep.subr.bf16.mxu1 %v5355_v11  ;;  %4733 = vmatprep.mubr.msk.bf16.mxu1 %vm5356_vm4, %v5355_v11 }
 0x2a5   :  { %4777 = vmatprep.subr.bf16.mxu0 %v5355_v11 }
 0x2a6   :  { %4766 = vmatmul.mubr.msk.bf16.vlgmr.msra.gmra.mrb[8].mxu0 %vm153_vm3, %v201_v0 }
 0x2a7   :  { %4732 = vmatpush3.bf16.msra.mxu1 %v5203_v3  ;;  %4779 = vmatprep.mubr.msk.bf16.mxu0 %vm5356_vm4, %v5355_v11 }
 0x2a8   :  { %4737 = vmatprep.subr.bf16.mxu1 %v5355_v11 }
 0x2aa   :  { %4734 = vmatmul.mubr.msk.bf16.vlgmr.msra.gmra.mrb[8].mxu1 %vm153_vm3, %v200_v60 }
 0x2ab   :  { %4738 = vmatpush3.bf16.msra.mxu1 %v5204_v4  ;;  %4741 = vmatprep.mubr.msk.bf16.mxu1 %vm5356_vm4, %v5355_v11 }
 0x2ac   :  { %4739 = vmatprep.subr.bf16.mxu1 %v5355_v11 }
 0x2af   :  { %4740 = vmatpush3.bf16.msra.mxu1 %v5205_v5 }
 0x2b0   :  { %4753 = vmatprep.subr.bf16.mxu1 %v5355_v11 }
 0x2b2   :  { %4742 = vmatmul.mubr.msk.bf16.vlgmr.msra.gmra.mrb[12].mxu1 %vm153_vm3, %v200_v60 }
 0x2b3   :  { %4754 = vmatpush3.bf16.msra.mxu1 %v5206_v6  ;;  %4757 = vmatprep.mubr.msk.bf16.mxu1 %vm5356_vm4, %v5355_v11 }
 0x2b4   :  { %4755 = vmatprep.subr.bf16.mxu1 %v5355_v11 }
 0x2b7   :  { %4756 = vmatpush3.bf16.msra.mxu1 %v5207_v7 }
 0x2b8   :  { %4769 = vmatprep.subr.bf16.mxu1 %v5355_v11 }
 0x2ba   :  { %4758 = vmatmul.mubr.msk.bf16.vlgmr.msra.gmra.mrb[16].mxu1 %vm153_vm3, %v201_v0 }
 0x2bb   :  { %4770 = vmatpush3.bf16.msra.mxu1 %v5208_v8  ;;  %4773 = vmatprep.mubr.msk.bf16.mxu1 %vm5356_vm4, %v5355_v11 }
 0x2bc   :  { %4771 = vmatprep.subr.bf16.mxu1 %v5355_v11 }
 0x2bf   :  { %4772 = vmatpush3.bf16.msra.mxu1 %v5209_v9 }
 0x2c0   :  { %4783 = vmatprep.subr.bf16.mxu1 %v5355_v11 }
 0x2c2   :  { %4774 = vmatmul.mubr.msk.bf16.vlgmr.msra.gmra.mrb[20].mxu1 %vm153_vm3, %v201_v0 }
 0x2c3   :  { %4785 = vmatprep.mubr.msk.bf16.mxu1 %vm5356_vm4, %v5355_v11 }
 0x36d   :  { %v339_v12 = vpop.f32.mrb[0].mxu1 }
 0x36e   :  { %v340_v13 = vadd.f32 %v4332_v10, %v339_v12  ;;  %v4719_v14 = vpop.f32.mrb[1].mxu1 }
 0x36f   :  { %v342_v15 = vpop.f32.mrb[2].mxu1 }
 0x370   :  { %v5586_v18 = vpack.c.bf16 %v340_v13, %v340_v13  ;;  %v4720_v19 = vpop.f32.mrb[3].mxu1 }
 0x371   :  { %v550_v20 = vpop.f32.mrb[4].mxu0 }
 0x372   :  { %v551_v21 = vadd.f32 %v4336_v17, %v550_v20  ;;  %733 = vrot.lane.b32.xlu1 %v5586_v18, %s5357_s2  ;;  %v4751_v22 = vpop.f32.mrb[5].mxu0 }
 0x373   :  { %v553_v23 = vpop.f32.mrb[6].mxu0 }
 0x374   :  { %v5593_v25 = vpack.c.bf16 %v551_v21, %v551_v21  ;;  %v4752_v26 = vpop.f32.mrb[7].mxu0 }
 0x375   :  { %v391_v27 = vpop.f32.mrb[4].mxu1 }
 0x376   :  { %v392_v28 = vadd.f32 %v4333_v24, %v391_v27  ;;  %v4727_v29 = vpop.f32.mrb[5].mxu1  ;;  %930 = vrot.lane.b32.xlu0 %v5593_v25, %s5357_s2 }
 0x377   :  { %v394_v30 = vpop.f32.mrb[6].mxu1  ;;  %v193_v29 = vld [vmem:[%s6400_s1] sm:$0x1] }
 0x378   :  { %v713_v31 = vpack.c.bf16 %v392_v28, %v392_v28  ;;  %v4728_v32 = vpop.f32.mrb[7].mxu1  ;;  %v5691_v30 = vshrl.u32 %v45_v16, 7 }
 0x379   :  { %v654_v33 = vpop.f32.mrb[8].mxu0 }
 0x37a   :  { %783 = vrot.lane.b32.xlu1 %v713_v31, %s5357_s2  ;;  %1221 = vrot.lane.b32.xlu0 %v5586_v18, %s5358_s24  ;;  %v4767_v34 = vpop.f32.mrb[9].mxu0  ;;  %v655_v58 = vadd.f32 %v4338_v52, %v654_v33  ;;  %v5694_v32 = vsub.s32 0, %v5691_v30 }
 0x37b   :  { %v657_v35 = vpop.f32.mrb[10].mxu0 }
 0x37c   :  { %v4768_v37 = vpop.f32.mrb[11].mxu0  ;;  %v5627_v63 = vpack.c.bf16 %v655_v58, %v655_v58 }
 0x37d   :  { %v443_v38 = vpop.f32.mrb[8].mxu1 }
 0x37e   :  { %v444_v39 = vadd.f32 %v4334_v36, %v443_v38  ;;  %v4735_v40 = vpop.f32.mrb[9].mxu1 }
 0x37f   :  { %v446_v41 = vpop.f32.mrb[10].mxu1 }
 0x380   :  { %v5603_v42 = vpack.c.bf16 %v444_v39, %v444_v39  ;;  %v4736_v43 = vpop.f32.mrb[11].mxu1 }
 0x382   :  { %832 = vrot.lane.b32.xlu1 %v5603_v42, %s5357_s2 }
 0x385   :  { %v495_v45 = vpop.f32.mrb[12].mxu1 }
 0x386   :  { %v496_v46 = vadd.f32 %v4335_v44, %v495_v45  ;;  %v4743_v47 = vpop.f32.mrb[13].mxu1  ;;  %v194_v45 = vld [vmem:[%s6400_s1 + $0x1] sm:$0x1] }
 0x387   :  { %v498_v48 = vpop.f32.mrb[14].mxu1 }
 0x388   :  { %v5610_v49 = vpack.c.bf16 %v496_v46, %v496_v46  ;;  %v4744_v50 = vpop.f32.mrb[15].mxu1  ;;  %v196_v48 = vsub.f32 1.0, %v194_v45 }
 0x38a   :  { %881 = vrot.lane.b32.xlu1 %v5610_v49, %s5357_s2 }
 0x38d   :  { %v602_v53 = vpop.f32.mrb[16].mxu1 }
 0x38e   :  { %v603_v54 = vadd.f32 %v4337_v51, %v602_v53  ;;  %v4759_v55 = vpop.f32.mrb[17].mxu1  ;;  %v198_v53 = vmul.f32 -1e+09, %v196_v48 }
 0x38f   :  { %v605_v56 = vpop.f32.mrb[18].mxu1 }
 0x390   :  { %v5620_v59 = vpack.c.bf16 %v603_v54, %v603_v54  ;;  %v4760_v60 = vpop.f32.mrb[19].mxu1  ;;  %v5712_v58 = vrot.slane %v198_v53, %v5694_v32 }
 0x392   :  { %979 = vrot.lane.b32.xlu1 %v5620_v59, %s5357_s2 }
 0x395   :  { %v706_v0 = vpop.f32.mrb[20].mxu1 }
 0x396   :  { %v707_v1 = vadd.f32 %v4339_v62, %v706_v0  ;;  %v4775_v2 = vpop.f32.mrb[21].mxu1  ;;  %1028 = vrot.lane.b32.xlu1 %v5627_v63, %s5357_s2 }
 0x397   :  { %v709_v3 = vpop.f32.mrb[22].mxu1 }
 0x398   :  { %v5631_v4 = vpack.c.bf16 %v707_v1, %v707_v1  ;;  %v4776_v5 = vpop.f32.mrb[23].mxu1 }
 0x39a   :  { %1077 = vrot.lane.b32.xlu1 %v5631_v4, %s5357_s2 }
 0x39e   :  { %1270 = vrot.lane.b32.xlu1 %v713_v31, %s5358_s24 }
 0x3e4   :  { %v734_v6 = vpop.permute.xlu1 %733 }
 0x3e5   :  { %v740_v7 = vsel %vm735_vm5, %v734_v6, 0 }
 0x3e6   :  { %4778 = vmatpush3.bf16.xpose.msra.mxu0 %v740_v7 }
 0x3e7   :  { %4789 = vmatprep.subr.bf16.mxu0 %v5355_v11 }
 0x3e8   :  { %v931_v13 = vpop.permute.xlu0 %930 }
 0x3e9   :  { %v936_v15 = vsel %vm735_vm5, %v931_v13, 0 }
 0x3ec   :  { %v784_v8 = vpop.permute.xlu1 %783  ;;  %v1222_v24 = vpop.permute.xlu0 %1221 }
 0x3ed   :  { %v789_v9 = vsel %vm735_vm5, %v784_v8, 0  ;;  %4780 = vmatmul.mubr.msk.bf16.vlgmr.msra.gmra.mrb[12].mxu0 %vm735_vm5, %v5586_v18  ;;  %v1228_v26 = vsel %vm1226_vm6, %v1222_v24, 0 }
 0x3ee   :  { %4784 = vmatpush3.bf16.xpose.msra.mxu1 %v789_v9  ;;  %4791 = vmatprep.mubr.msk.bf16.mxu0 %vm5356_vm4, %v5355_v11 }
 0x3ef   :  { %4795 = vmatprep.subr.bf16.mxu1 %v5355_v11 }
 0x3f4   :  { %v833_v10 = vpop.permute.xlu1 %832 }
 0x3f5   :  { %v838_v12 = vsel %vm735_vm5, %v833_v10, 0  ;;  %4786 = vmatmul.mubr.msk.bf16.vlgmr.msra.gmra.mrb[24].mxu1 %vm735_vm5, %v713_v31  ;;  %v195_v31 = vsub.f32 1.0, %v193_v29 }
 0x3f6   :  { %4790 = vmatpush3.bf16.xpose.msra.mxu0 %v838_v12  ;;  %4797 = vmatprep.mubr.msk.bf16.mxu1 %vm5356_vm4, %v5355_v11 }
 0x3f7   :  { %4801 = vmatprep.subr.bf16.mxu0 %v5355_v11  ;;  %v197_v33 = vmul.f32 -1e+09, %v195_v31 }
 0x3f9   :  { %v5697_v34 = vrot.slane %v197_v33, %v5694_v32 }
 0x3fc   :  { %v882_v14 = vpop.permute.xlu1 %881 }
 0x3fd   :  { %v887_v17 = vsel %vm735_vm5, %v882_v14, 0  ;;  %4792 = vmatmul.mubr.msk.bf16.vlgmr.msra.gmra.mrb[16].mxu0 %vm735_vm5, %v5603_v42 }
 0x3fe   :  { %4796 = vmatpush3.bf16.xpose.msra.mxu1 %v887_v17  ;;  %4802 = vmatpush3.bf16.xpose.msra.mxu0 %v936_v15 }
 0x3ff   :  { %4803 = vmatprep.mubr.msk.bf16.mxu0 %vm5356_vm4, %v5355_v11  ;;  %4807 = vmatprep.subr.bf16.mxu1 %v5355_v11 }
 0x400   :  { %4813 = vmatprep.subr.bf16.mxu0 %v5355_v11 }
 0x404   :  { %v980_v18 = vpop.permute.xlu1 %979 }
 0x405   :  { %v985_v19 = vsel %vm735_vm5, %v980_v18, 0  ;;  %4798 = vmatmul.mubr.msk.bf16.vlgmr.msra.gmra.mrb[28].mxu1 %vm735_vm5, %v5610_v49  ;;  %4804 = vmatmul.mubr.msk.bf16.vlgmr.msra.gmra.mrb[20].mxu0 %vm735_vm5, %v5593_v25 }
 0x406   :  { %4808 = vmatpush3.bf16.xpose.msra.mxu1 %v985_v19  ;;  %4809 = vmatprep.mubr.msk.bf16.mxu1 %vm5356_vm4, %v5355_v11 }
 0x407   :  { %4819 = vmatprep.subr.bf16.mxu1 %v5355_v11  ;;  %4815 = vmatprep.mubr.msk.bf16.mxu0 %vm5356_vm4, %v5355_v11 }
 0x408   :  { %v1029_v20 = vpop.permute.xlu1 %1028 }
 0x409   :  { %v1034_v21 = vsel %vm735_vm5, %v1029_v20, 0 }
 0x40a   :  { %4814 = vmatpush3.bf16.xpose.msra.mxu0 %v1034_v21 }
 0x40b   :  { %4825 = vmatprep.subr.bf16.mxu0 %v5355_v11 }
 0x40c   :  { %v1078_v22 = vpop.permute.xlu1 %1077 }
 0x40d   :  { %v1083_v23 = vsel %vm735_vm5, %v1078_v22, 0  ;;  %4810 = vmatmul.mubr.msk.bf16.vlgmr.msra.gmra.mrb[32].mxu1 %vm735_vm5, %v5620_v59 }
 0x40e   :  { %4820 = vmatpush3.bf16.xpose.msra.mxu1 %v1083_v23  ;;  %4821 = vmatprep.mubr.msk.bf16.mxu1 %vm5356_vm4, %v5355_v11 }
 0x40f   :  { %4831 = vmatprep.subr.bf16.mxu1 %v5355_v11 }
 0x410   :  { %v1271_v27 = vpop.permute.xlu1 %1270 }
 0x411   :  { %4816 = vmatmul.mubr.msk.bf16.vlgmr.msra.gmra.mrb[24].mxu0 %vm735_vm5, %v5627_v63  ;;  %v1276_v28 = vsel %vm1226_vm6, %v1271_v27, 0 }
 0x412   :  { %4826 = vmatpush3.bf16.msra.mxu0 %v1228_v26  ;;  %4827 = vmatprep.mubr.msk.bf16.mxu0 %vm5356_vm4, %v5355_v11 }
 0x413   :  { %4837 = vmatprep.subr.bf16.mxu0 %v5355_v11 }
 0x415   :  { %4822 = vmatmul.mubr.msk.bf16.vlgmr.msra.gmra.mrb[36].mxu1 %vm735_vm5, %v5631_v4 }
 0x416   :  { %4832 = vmatpush3.bf16.msra.mxu1 %v1276_v28  ;;  %4833 = vmatprep.mubr.msk.bf16.mxu1 %vm5356_vm4, %v5355_v11 }
 0x417   :  { %4843 = vmatprep.subr.bf16.mxu1 %v5355_v11 }
 0x4c0   :  { %v776_v35 = vpop.f32.mrb[12].mxu0 }
 0x4c1   :  { %v5700_v36 = vadd.f32 %v776_v35, %v5697_v34  ;;  %v4781_v37 = vpop.f32.mrb[13].mxu0 }
 0x4c2   :  { %v779_v38 = vpop.f32.mrb[14].mxu0 }
 0x4c3   :  { %v4782_v39 = vpop.f32.mrb[15].mxu0  ;;  %v1125_v40 = vsel %vm735_vm5, %v5700_v36, -inf }
 0x4c4   :  { %1126 = vmax.xlane.f32.xlu1 %v1125_v40 }
 0x4c8   :  { %v825_v16 = vpop.f32.mrb[24].mxu1 }
 0x4c9   :  { %v826_v41 = vadd.f32 %v825_v16, %v5697_v34  ;;  %v4787_v43 = vpop.f32.mrb[25].mxu1 }
 0x4ca   :  { %v828_v44 = vpop.f32.mrb[26].mxu1 }
 0x4cb   :  { %v4788_v46 = vpop.f32.mrb[27].mxu1  ;;  %v1128_v47 = vsel %vm735_vm5, %v826_v41, -inf }
 0x4cc   :  { %1129 = vmax.xlane.f32.xlu0 %v1128_v47 }
 0x4d0   :  { %v874_v50 = vpop.f32.mrb[16].mxu0 }
 0x4d1   :  { %v875_v51 = vadd.f32 %v874_v50, %v5697_v34  ;;  %v4793_v52 = vpop.f32.mrb[17].mxu0 }
 0x4d2   :  { %v877_v54 = vpop.f32.mrb[18].mxu0 }
 0x4d3   :  { %v4794_v55 = vpop.f32.mrb[19].mxu0  ;;  %v1131_v56 = vsel %vm735_vm5, %v875_v51, -inf }
 0x4d4   :  { %1132 = vmax.xlane.f32.xlu1 %v1131_v56 }
 0x4d8   :  { %v923_v60 = vpop.f32.mrb[28].mxu1  ;;  %v972_v62 = vpop.f32.mrb[20].mxu0 }
 0x4d9   :  { %v924_v0 = vadd.f32 %v923_v60, %v5697_v34  ;;  %v5716_v1 = vadd.f32 %v972_v62, %v5712_v58  ;;  %v4799_v2 = vpop.f32.mrb[29].mxu1  ;;  %v4805_v3 = vpop.f32.mrb[21].mxu0 }
 0x4da   :  { %v926_v5 = vpop.f32.mrb[30].mxu1  ;;  %v975_v6 = vpop.f32.mrb[22].mxu0 }
 0x4db   :  { %v4800_v7 = vpop.f32.mrb[31].mxu1  ;;  %v4806_v8 = vpop.f32.mrb[23].mxu0  ;;  %v1137_v9 = vsel %vm735_vm5, %v5716_v1, -inf  ;;  %v1134_v10 = vsel %vm735_vm5, %v924_v0, -inf }
 0x4dc   :  { %1138 = vmax.xlane.f32.xlu1 %v1137_v9  ;;  %1135 = vmax.xlane.f32.xlu0 %v1134_v10 }
 0x4e0   :  { %v1021_v12 = vpop.f32.mrb[32].mxu1 }
 0x4e1   :  { %v5722_v13 = vadd.f32 %v1021_v12, %v5712_v58  ;;  %v4811_v14 = vpop.f32.mrb[33].mxu1 }
 0x4e2   :  { %v1024_v15 = vpop.f32.mrb[34].mxu1 }
 0x4e3   :  { %v4812_v17 = vpop.f32.mrb[35].mxu1  ;;  %v1140_v18 = vsel %vm735_vm5, %v5722_v13, -inf }
 0x4e4   :  { %1141 = vmax.xlane.f32.xlu0 %v1140_v18  ;;  %v1070_v19 = vpop.f32.mrb[24].mxu0 }
 0x4e5   :  { %v1071_v20 = vadd.f32 %v1070_v19, %v5712_v58  ;;  %v4817_v21 = vpop.f32.mrb[25].mxu0 }
 0x4e6   :  { %v1073_v22 = vpop.f32.mrb[26].mxu0 }
 0x4e7   :  { %v4818_v23 = vpop.f32.mrb[27].mxu0  ;;  %v1143_v24 = vsel %vm735_vm5, %v1071_v20, -inf }
 0x4e8   :  { %1144 = vmax.xlane.f32.xlu1 %v1143_v24  ;;  %v1119_v26 = vpop.f32.mrb[36].mxu1 }
 0x4e9   :  { %v1120_v27 = vadd.f32 %v1119_v26, %v5712_v58  ;;  %v4823_v28 = vpop.f32.mrb[37].mxu1 }
 0x4ea   :  { %v1122_v29 = vpop.f32.mrb[38].mxu1 }
 0x4eb   :  { %v4824_v31 = vpop.f32.mrb[39].mxu1  ;;  %v1146_v33 = vsel %vm735_vm5, %v1120_v27, -inf }
 0x4ec   :  { %1147 = vmax.xlane.f32.xlu0 %v1146_v33 }
 0x4f9   :  { %1366 = vrot.lane.b32.xlu1 %v5610_v49, %s5358_s24 }
 0x502   :  { %1318 = vrot.lane.b32.xlu0 %v5603_v42, %s5358_s24 }
 0x551   :  { %v1127_v35 = vpop.xlane.xlu1 %1126 }
 0x552   :  { %v1149_v37 = vsub.f32 %v5700_v36, %v1127_v35 }
 0x554   :  { %v1157_v38 = vmul.f32 1.442695, %v1149_v37 }
 0x556   :  { %5242 = vpow2.f32 %v1157_v38 }
 0x559   :  { %v1130_v39 = vpop.xlane.xlu0 %1129 }
 0x55a   :  { %v1150_v40 = vsub.f32 %v826_v41, %v1130_v39 }
 0x55c   :  { %v1159_v16 = vmul.f32 1.442695, %v1150_v40 }
 0x55e   :  { %5244 = vpow2.f32 %v1159_v16 }
 0x560   :  { %v5243_v43 = vpop.eup %5242 }
 0x561   :  { %v1133_v44 = vpop.xlane.xlu1 %1132  ;;  %v1173_v45 = vsel %vm735_vm5, %v5243_v43, 0.0 }
 0x562   :  { %v1151_v46 = vsub.f32 %v875_v51, %v1133_v44  ;;  %1174 = vadd.xlane.f32.xlu1 %v1173_v45 }
 0x564   :  { %v1161_v47 = vmul.f32 1.442695, %v1151_v46 }
 0x566   :  { %5246 = vpow2.f32 %v1161_v47 }
 0x568   :  { %v5245_v49 = vpop.eup %5244 }
 0x569   :  { %v1136_v48 = vpop.xlane.xlu0 %1135  ;;  %v1176_v42 = vsel %vm735_vm5, %v5245_v49, 0.0  ;;  %v1139_v54 = vpop.xlane.xlu1 %1138 }
 0x56a   :  { %v1152_v50 = vsub.f32 %v924_v0, %v1136_v48  ;;  %1177 = vadd.xlane.f32.xlu0 %v1176_v42  ;;  %v1153_v55 = vsub.f32 %v5716_v1, %v1139_v54 }
 0x56c   :  { %v1163_v36 = vmul.f32 1.442695, %v1152_v50  ;;  %v1165_v62 = vmul.f32 1.442695, %v1153_v55 }
 0x56e   :  { %5248 = vpow2.f32 %v1163_v36 }
 0x56f   :  { %5250 = vpow2.f32 %v1165_v62 }
 0x570   :  { %v5737_v52 = vpop.eup %5246 }
 0x571   :  { %v1179_v41 = vsel %vm735_vm5, %v5737_v52, 0.0  ;;  %v1142_v56 = vpop.xlane.xlu0 %1141 }
 0x572   :  { %1180 = vadd.xlane.f32.xlu1 %v1179_v41  ;;  %v1154_v3 = vsub.f32 %v5722_v13, %v1142_v56 }
 0x574   :  { %v1167_v7 = vmul.f32 1.442695, %v1154_v3 }
 0x575   :  { %v1145_v60 = vpop.xlane.xlu1 %1144 }
 0x576   :  { %v1155_v0 = vsub.f32 %v1071_v20, %v1145_v60 }
 0x578   :  { %v5741_v53 = vpop.eup %5248  ;;  %v1169_v5 = vmul.f32 1.442695, %v1155_v0 }
 0x579   :  { %v1182_v51 = vsel %vm735_vm5, %v5741_v53, 0.0  ;;  %v1148_v2 = vpop.xlane.xlu0 %1147  ;;  %v1367_v15 = vpop.permute.xlu1 %1366 }
 0x57a   :  { %1183 = vadd.xlane.f32.xlu0 %v1182_v51  ;;  %v1156_v6 = vsub.f32 %v1120_v27, %v1148_v2  ;;  %5252 = vpow2.f32 %v1169_v5  ;;  %v1372_v27 = vsel %vm1226_vm6, %v1367_v15, 0  ;;  %v1614_v2 = vld [vmem:[%s6406_s7] sm:$0xf] }
 0x57b   :  { %5254 = vpow2.f32 %v1167_v7  ;;  %v1626_v5 = vsel %vm1226_vm6, %v1614_v2, 0 }
 0x57c   :  { %v1171_v8 = vmul.f32 1.442695, %v1156_v6  ;;  %v1615_v6 = vld [vmem:[%s6406_s7 + $0x4] sm:$0xf] }
 0x57d   :  { %v1319_v18 = vpop.permute.xlu0 %1318  ;;  %v1672_v7 = vsel %vm1226_vm6, %v1615_v6, 0 }
 0x57e   :  { %5256 = vpow2.f32 %v1171_v8  ;;  %v1324_v23 = vsel %vm1226_vm6, %v1319_v18, 0  ;;  %v1616_v8 = vld [vmem:[%s6406_s7 + $0x8] sm:$0xf] }
 0x583   :  { %1462 = vrot.lane.b32.xlu1 %v5620_v59, %s5358_s24  ;;  %v5751_v59 = vpop.eup %5250 }
 0x584   :  { %v5755_v1 = vpop.eup %5252 }
 0x585   :  { %v5757_v9 = vpop.eup %5254  ;;  %v1191_v10 = vsel %vm735_vm5, %v5755_v1, 0.0 }
 0x586   :  { %v1188_v13 = vsel %vm735_vm5, %v5757_v9, 0.0 }
 0x588   :  { %v5761_v12 = vpop.eup %5256 }
 0x589   :  { %v1194_v14 = vsel %vm735_vm5, %v5761_v12, 0.0 }
 0x590   :  { %1414 = vrot.lane.b32.xlu0 %v5593_v25, %s5358_s24  ;;  %v1185_v25 = vsel %vm735_vm5, %v5751_v59, 0.0 }
 0x5a7   :  { %1186 = vadd.xlane.f32.xlu1 %v1185_v25 }
 0x5ab   :  { %1192 = vadd.xlane.f32.xlu1 %v1191_v10 }
 0x5af   :  { %1189 = vadd.xlane.f32.xlu0 %v1188_v13  ;;  %1195 = vadd.xlane.f32.xlu1 %v1194_v14  ;;  %v1617_v13 = vld [vmem:[%s6406_s7 + $0xc] sm:$0xf] }
 0x5b0   :  { %v1764_v18 = vsel %vm1226_vm6, %v1617_v13, 0 }
 0x5c0   :  { %1558 = vrot.lane.b32.xlu1 %v5631_v4, %s5358_s24 }
 0x5c5   :  { %1510 = vrot.lane.b32.xlu0 %v5627_v63, %s5358_s24 }
 0x5ef   :  { %v1175_v17 = vpop.xlane.xlu1 %1174 }
 0x5f0   :  { %5258 = vrcp.f32 %v1175_v17 }
 0x5f7   :  { %v1178_v19 = vpop.xlane.xlu0 %1177 }
 0x5f8   :  { %5260 = vrcp.f32 %v1178_v19 }
 0x5fa   :  { %v5259_v20 = vpop.eup %5258 }
 0x5fb   :  { %v1205_v21 = vmul.f32 %v5259_v20, %v5243_v43 }
 0x5fd   :  { %v1213_v22 = vpack.c.bf16 %v1205_v21, %v1205_v21  ;;  %v1618_v21 = vld [vmem:[%s6406_s7 + $0x10] sm:$0xf] }
 0x5ff   :  { %4828 = vmatmul.mubr.msk.bf16.vlgmr.msra.gmra.mrb[28].mxu0 %vm735_vm5, %v1213_v22  ;;  %v1181_v24 = vpop.xlane.xlu1 %1180 }
 0x600   :  { %4838 = vmatpush3.bf16.msra.mxu0 %v1324_v23  ;;  %5262 = vrcp.f32 %v1181_v24  ;;  %4839 = vmatprep.mubr.msk.bf16.mxu0 %vm5356_vm4, %v5355_v11 }
 0x601   :  { %4849 = vmatprep.subr.bf16.mxu0 %v5355_v11 }
 0x602   :  { %v5261_v63 = vpop.eup %5260 }
 0x603   :  { %v1206_v4 = vmul.f32 %v5261_v63, %v5245_v49  ;;  %v1463_v40 = vpop.permute.xlu1 %1462  ;;  %v1810_v63 = vsel %vm1226_vm6, %v1618_v21, 0 }
 0x604   :  { %v1468_v43 = vsel %vm1226_vm6, %v1463_v40, 0 }
 0x605   :  { %v1214_v26 = vpack.c.bf16 %v1206_v4, %v1206_v4 }
 0x607   :  { %v1184_v28 = vpop.xlane.xlu0 %1183  ;;  %4834 = vmatmul.mubr.msk.bf16.vlgmr.msra.gmra.mrb[40].mxu1 %vm735_vm5, %v1214_v26 }
 0x608   :  { %5264 = vrcp.f32 %v1184_v28  ;;  %4844 = vmatpush3.bf16.msra.mxu1 %v1372_v27  ;;  %4845 = vmatprep.mubr.msk.bf16.mxu1 %vm5356_vm4, %v5355_v11  ;;  %v1619_v27 = vld [vmem:[%s6406_s7 + $0x14] sm:$0xf] }
 0x609   :  { %4855 = vmatprep.subr.bf16.mxu1 %v5355_v11 }
 0x60a   :  { %v5263_v29 = vpop.eup %5262 }
 0x60b   :  { %v1207_v31 = vmul.f32 %v5263_v29, %v5737_v52  ;;  %v1415_v33 = vpop.permute.xlu0 %1414 }
 0x60c   :  { %v1420_v37 = vsel %vm1226_vm6, %v1415_v33, 0  ;;  %v1856_v33 = vsel %vm1226_vm6, %v1619_v27, 0 }
 0x60d   :  { %v1215_v35 = vpack.c.bf16 %v1207_v31, %v1207_v31 }
 0x60f   :  { %4840 = vmatmul.mubr.msk.bf16.vlgmr.msra.gmra.mrb[32].mxu0 %vm735_vm5, %v1215_v35 }
 0x610   :  { %4850 = vmatpush3.bf16.msra.mxu0 %v1420_v37  ;;  %4851 = vmatprep.mubr.msk.bf16.mxu0 %vm5356_vm4, %v5355_v11 }
 0x611   :  { %4861 = vmatprep.subr.bf16.mxu0 %v5355_v11 }
 0x612   :  { %v5265_v38 = vpop.eup %5264 }
 0x613   :  { %v1208_v39 = vmul.f32 %v5265_v38, %v5741_v53  ;;  %v1620_v38 = vld [vmem:[%s6406_s7 + $0x18] sm:$0xf] }
 0x615   :  { %v1216_v16 = vpack.c.bf16 %v1208_v39, %v1208_v39 }
 0x617   :  { %4846 = vmatmul.mubr.msk.bf16.vlgmr.msra.gmra.mrb[44].mxu1 %vm735_vm5, %v1216_v16 }
 0x618   :  { %4856 = vmatpush3.bf16.msra.mxu1 %v1468_v43  ;;  %4857 = vmatprep.mubr.msk.bf16.mxu1 %vm5356_vm4, %v5355_v11  ;;  %v1902_v43 = vsel %vm1226_vm6, %v1620_v38, 0 }
 0x619   :  { %4867 = vmatprep.subr.bf16.mxu1 %v5355_v11 }
 0x634   :  { %v1187_v44 = vpop.xlane.xlu1 %1186 }
 0x635   :  { %5266 = vrcp.f32 %v1187_v44 }
 0x638   :  { %v1193_v45 = vpop.xlane.xlu1 %1192 }
 0x639   :  { %5268 = vrcp.f32 %v1193_v45 }
 0x63c   :  { %v1190_v46 = vpop.xlane.xlu0 %1189  ;;  %v1196_v47 = vpop.xlane.xlu1 %1195 }
 0x63d   :  { %5270 = vrcp.f32 %v1190_v46  ;;  %v1621_v46 = vld [vmem:[%s6406_s7 + $0x1c] sm:$0xf] }
 0x63e   :  { %5272 = vrcp.f32 %v1196_v47 }
 0x63f   :  { %v5267_v49 = vpop.eup %5266 }
 0x640   :  { %v1209_v48 = vmul.f32 %v5267_v49, %v5751_v59  ;;  %v1511_v42 = vpop.permute.xlu0 %1510  ;;  %v1559_v54 = vpop.permute.xlu1 %1558 }
 0x641   :  { %v1516_v52 = vsel %vm1226_vm6, %v1511_v42, 0  ;;  %v1564_v62 = vsel %vm1226_vm6, %v1559_v54, 0 }
 0x642   :  { %v1217_v50 = vpack.c.bf16 %v1209_v48, %v1209_v48 }
 0x643   :  { %v5269_v36 = vpop.eup %5268 }
 0x644   :  { %4852 = vmatmul.mubr.msk.bf16.vlgmr.msra.gmra.mrb[36].mxu0 %vm735_vm5, %v1217_v50  ;;  %v1211_v41 = vmul.f32 %v5269_v36, %v5755_v1 }
 0x645   :  { %4862 = vmatpush3.bf16.msra.mxu0 %v1516_v52  ;;  %4863 = vmatprep.mubr.msk.bf16.mxu0 %vm5356_vm4, %v5355_v11  ;;  %v1948_v52 = vsel %vm1226_vm6, %v1621_v46, 0 }
 0x646   :  { %4873 = vmatprep.subr.bf16.mxu0 %v5355_v11  ;;  %v1219_v56 = vpack.c.bf16 %v1211_v41, %v1211_v41 }
 0x647   :  { %v5271_v53 = vpop.eup %5270 }
 0x648   :  { %v1210_v51 = vmul.f32 %v5271_v53, %v5757_v9  ;;  %v5273_v60 = vpop.eup %5272  ;;  %v1718_v9 = vsel %vm1226_vm6, %v1616_v8, 0 }
 0x649   :  { %v1212_v0 = vmul.f32 %v5273_v60, %v5761_v12 }
 0x64a   :  { %v1218_v55 = vpack.c.bf16 %v1210_v51, %v1210_v51 }
 0x64b   :  { %v1220_v3 = vpack.c.bf16 %v1212_v0, %v1212_v0 }
 0x64c   :  { %4858 = vmatmul.mubr.msk.bf16.vlgmr.msra.gmra.mrb[48].mxu1 %vm735_vm5, %v1218_v55  ;;  %4864 = vmatmul.mubr.msk.bf16.vlgmr.msra.gmra.mrb[40].mxu0 %vm735_vm5, %v1219_v56 }
 0x64d   :  { %4868 = vmatpush3.bf16.msra.mxu1 %v1564_v62  ;;  %4869 = vmatprep.mubr.msk.bf16.mxu1 %vm5356_vm4, %v5355_v11 }
 0x64e   :  { %4875 = vmatprep.mubr.msk.bf16.mxu0 %vm5356_vm4, %v5355_v11  ;;  %4879 = vmatprep.subr.bf16.mxu1 %v5355_v11 }
 0x64f   :  { %4874 = vmatpush3.bf16.msra.mxu0 %v1626_v5 }
 0x650   :  { %4885 = vmatprep.subr.bf16.mxu0 %v5355_v11 }
 0x654   :  { %4870 = vmatmul.mubr.msk.bf16.vlgmr.msra.gmra.mrb[52].mxu1 %vm735_vm5, %v1220_v3 }
 0x655   :  { %4881 = vmatprep.mubr.msk.bf16.mxu1 %vm5356_vm4, %v5355_v11  ;;  %4880 = vmatpush3.bf16.msra.mxu1 %v1672_v7 }
 0x656   :  { %4891 = vmatprep.subr.bf16.mxu1 %v5355_v11 }
 0x6d2   :  { %v1264_v59 = vpop.f32.mrb[28].mxu0 }
 0x6d3   :  { %v1606_v25 = vpack.c.bf16 %v1264_v59, %v1264_v59  ;;  %v4829_v1 = vpop.f32.mrb[29].mxu0 }
 0x6d4   :  { %v1267_v10 = vpop.f32.mrb[30].mxu0 }
 0x6d5   :  { %v4830_v12 = vpop.f32.mrb[31].mxu0  ;;  %4876 = vmatmul.mubr.msk.bf16.vlgmr.msra.gmra.mrb[44].mxu0 %vm735_vm5, %v1606_v25 }
 0x6d6   :  { %4886 = vmatpush3.bf16.msra.mxu0 %v1718_v9  ;;  %4887 = vmatprep.mubr.msk.bf16.mxu0 %vm5356_vm4, %v5355_v11 }
 0x6d7   :  { %4897 = vmatprep.subr.bf16.mxu0 %v5355_v11 }
 0x6da   :  { %v1312_v14 = vpop.f32.mrb[40].mxu1 }
 0x6db   :  { %v1607_v15 = vpack.c.bf16 %v1312_v14, %v1312_v14  ;;  %v4835_v17 = vpop.f32.mrb[41].mxu1 }
 0x6dc   :  { %v1315_v19 = vpop.f32.mrb[42].mxu1 }
 0x6dd   :  { %v4836_v20 = vpop.f32.mrb[43].mxu1  ;;  %4882 = vmatmul.mubr.msk.bf16.vlgmr.msra.gmra.mrb[56].mxu1 %vm735_vm5, %v1607_v15  ;;  %v5883_v19 = vld [vmem:[%s6410_s11] sm:$0x3f] }
 0x6de   :  { %4892 = vmatpush3.bf16.msra.mxu1 %v1764_v18  ;;  %4893 = vmatprep.mubr.msk.bf16.mxu1 %vm5356_vm4, %v5355_v11  ;;  %v2007_v21 = vrot.slane %v5883_v19, %v5694_v32 }
 0x6df   :  { %4903 = vmatprep.subr.bf16.mxu1 %v5355_v11 }
 0x6e2   :  { %v1360_v22 = vpop.f32.mrb[32].mxu0 }
 0x6e3   :  { %v1608_v23 = vpack.c.bf16 %v1360_v22, %v1360_v22  ;;  %v4841_v24 = vpop.f32.mrb[33].mxu0 }
 0x6e4   :  { %v1363_v4 = vpop.f32.mrb[34].mxu0 }
 0x6e5   :  { %v4842_v26 = vpop.f32.mrb[35].mxu0  ;;  %4888 = vmatmul.mubr.msk.bf16.vlgmr.msra.gmra.mrb[48].mxu0 %vm735_vm5, %v1608_v23 }
 0x6e6   :  { %4898 = vmatpush3.bf16.msra.mxu0 %v1810_v63  ;;  %4899 = vmatprep.mubr.msk.bf16.mxu0 %vm5356_vm4, %v5355_v11 }
 0x6e7   :  { %4909 = vmatprep.subr.bf16.mxu0 %v5355_v11 }
 0x6ea   :  { %v1408_v28 = vpop.f32.mrb[44].mxu1 }
 0x6eb   :  { %v1609_v29 = vpack.c.bf16 %v1408_v28, %v1408_v28  ;;  %v4847_v31 = vpop.f32.mrb[45].mxu1 }
 0x6ec   :  { %v1411_v35 = vpop.f32.mrb[46].mxu1 }
 0x6ed   :  { %v4848_v37 = vpop.f32.mrb[47].mxu1  ;;  %4894 = vmatmul.mubr.msk.bf16.vlgmr.msra.gmra.mrb[60].mxu1 %vm735_vm5, %v1609_v29 }
 0x6ee   :  { %4904 = vmatpush3.bf16.msra.mxu1 %v1856_v33  ;;  %4905 = vmatprep.mubr.msk.bf16.mxu1 %vm5356_vm4, %v5355_v11 }
 0x6ef   :  { %4915 = vmatprep.subr.bf16.mxu1 %v5355_v11 }
 0x717   :  { %v1456_v39 = vpop.f32.mrb[36].mxu0 }
 0x718   :  { %v1610_v40 = vpack.c.bf16 %v1456_v39, %v1456_v39  ;;  %v4853_v16 = vpop.f32.mrb[37].mxu0 }
 0x719   :  { %v1459_v44 = vpop.f32.mrb[38].mxu0 }
 0x71a   :  { %v4854_v45 = vpop.f32.mrb[39].mxu0  ;;  %4900 = vmatmul.mubr.msk.bf16.vlgmr.msra.gmra.mrb[52].mxu0 %vm735_vm5, %v1610_v40 }
 0x71b   :  { %4910 = vmatpush3.bf16.msra.mxu0 %v1902_v43  ;;  %4911 = vmatprep.mubr.msk.bf16.mxu0 %vm5356_vm4, %v5355_v11 }
 0x71c   :  { %4921 = vmatprep.subr.bf16.mxu0 %v5355_v11 }
 0x71f   :  { %v1504_v47 = vpop.f32.mrb[48].mxu1  ;;  %v1552_v49 = vpop.f32.mrb[40].mxu0 }
 0x720   :  { %v1611_v48 = vpack.c.bf16 %v1504_v47, %v1504_v47  ;;  %v1612_v42 = vpack.c.bf16 %v1552_v49, %v1552_v49  ;;  %v4859_v50 = vpop.f32.mrb[49].mxu1  ;;  %v4865_v36 = vpop.f32.mrb[41].mxu0 }
 0x721   :  { %v1507_v41 = vpop.f32.mrb[50].mxu1  ;;  %v1555_v53 = vpop.f32.mrb[42].mxu0 }
 0x722   :  { %v4860_v51 = vpop.f32.mrb[51].mxu1  ;;  %v4866_v54 = vpop.f32.mrb[43].mxu0  ;;  %4906 = vmatmul.mubr.msk.bf16.vlgmr.msra.gmra.mrb[64].mxu1 %vm735_vm5, %v1611_v48  ;;  %4912 = vmatmul.mubr.msk.bf16.vlgmr.msra.gmra.mrb[56].mxu0 %vm735_vm5, %v1612_v42 }
 0x723   :  { %4916 = vmatpush3.bf16.msra.mxu1 %v1948_v52  ;;  %4917 = vmatprep.mubr.msk.bf16.mxu1 %vm5356_vm4, %v5355_v11 }
 0x724   :  { %4925 = vmatprep.mubr.msk.bf16.mxu0 %vm5356_vm4, %v5355_v11  ;;  %4929 = vmatprep.subr.bf16.mxu1 %v5355_v11 }
 0x727   :  { %v1600_v55 = vpop.f32.mrb[52].mxu1 }
 0x728   :  { %v1613_v56 = vpack.c.bf16 %v1600_v55, %v1600_v55  ;;  %v4871_v60 = vpop.f32.mrb[53].mxu1 }
 0x729   :  { %v1603_v62 = vpop.f32.mrb[54].mxu1 }
 0x72a   :  { %v4872_v0 = vpop.f32.mrb[55].mxu1  ;;  %4918 = vmatmul.mubr.msk.bf16.vlgmr.msra.gmra.mrb[68].mxu1 %vm735_vm5, %v1613_v56 }
 0x72b   :  { %4937 = vmatprep.mubr.msk.bf16.mxu1 %vm5356_vm4, %v5355_v11 }
 0x7a8   :  { %v1662_v2 = vpop.f32.mrb[44].mxu0 }
 0x7a9   :  { %v4877_v3 = vpop.f32.mrb[45].mxu0  ;;  %v1990_v8 = vsel %vm153_vm3, %v1662_v2, 0.0 }
 0x7aa   :  { %v1665_v5 = vpop.f32.mrb[46].mxu0 }
 0x7ab   :  { %v4878_v6 = vpop.f32.mrb[47].mxu0 }
 0x7b0   :  { %v1708_v7 = vpop.f32.mrb[56].mxu1 }
 0x7b1   :  { %v1991_v59 = vsel %vm153_vm3, %v1708_v7, 0.0  ;;  %v4883_v25 = vpop.f32.mrb[57].mxu1 }
 0x7b2   :  { %v1992_v1 = vadd.f32 %v1991_v59, %v1990_v8  ;;  %v1711_v9 = vpop.f32.mrb[58].mxu1  ;;  %v5211_v59 = vld [vmem:[%s6407_s8 + $0x8] sm:$0xff]  }
 0x7b3   :  { %v4884_v10 = vpop.f32.mrb[59].mxu1 }
 0x7b8   :  { %v1754_v12 = vpop.f32.mrb[48].mxu0 }
 0x7b9   :  { %v1993_v13 = vsel %vm153_vm3, %v1754_v12, 0.0  ;;  %v4889_v14 = vpop.f32.mrb[49].mxu0 }
 0x7ba   :  { %v1994_v15 = vadd.f32 %v1993_v13, %v1992_v1  ;;  %v1757_v17 = vpop.f32.mrb[50].mxu0  ;;  %v2040_v14 = vsub.s32 1, %v5691_v30 }
 0x7bb   :  { %v4890_v18 = vpop.f32.mrb[51].mxu0 }
 0x7bc   :  { %v2041_v17 = vrot.slane %v5883_v19, %v2040_v14 }
 0x7c0   :  { %v1800_v20 = vpop.f32.mrb[60].mxu1 }
 0x7c1   :  { %v1995_v22 = vsel %vm153_vm3, %v1800_v20, 0.0  ;;  %v4895_v23 = vpop.f32.mrb[61].mxu1  ;;  %v2046_v20 = vsub.s32 2, %v5691_v30 }
 0x7c2   :  { %v1996_v24 = vadd.f32 %v1995_v22, %v1994_v15  ;;  %v1803_v63 = vpop.f32.mrb[62].mxu1 }
 0x7c3   :  { %v4896_v4 = vpop.f32.mrb[63].mxu1 }
 0x7c4   :  { %v2008_v26 = vadd.f32 %v2007_v21, %v1996_v24  ;;  %v2047_v24 = vrot.slane %v5883_v19, %v2046_v20 }
 0x7c6   :  { %v2010_v27 = vadd.f32 %v2008_v26, %v5500_v57 }
 0x7c8   :  { %v2012_v28 = vsel %vm153_vm3, %v2010_v27, 0.0 }
 0x7c9   :  { %2013 = vadd.xlane.f32.xlu0 %v2012_v28  ;;  %v5212_v28 = vld [vmem:[%s6409_s10] sm:$0xff]  }
 0x7ca   :  { %4930 = vmatpush3.bf16.msra.mxu1 %v5212_v28 }
 0x7cb   :  { %4931 = vmatprep.subr.bf16.mxu1 %v5355_v11 }
 0x7ed   :  { %v1846_v29 = vpop.f32.mrb[52].mxu0 }
 0x7ee   :  { %v4901_v31 = vpop.f32.mrb[53].mxu0  ;;  %v1997_v39 = vsel %vm153_vm3, %v1846_v29, 0.0  ;;  %v5213_v29 = vld [vmem:[%s6409_s10 + $0x8] sm:$0xff]  }
 0x7ef   :  { %v1849_v33 = vpop.f32.mrb[54].mxu0  ;;  %4932 = vmatpush3.bf16.msra.mxu1 %v5213_v29  ;;  %v5214_v31 = vld [vmem:[%s6409_s10 + $0x10] sm:$0xff]  }
 0x7f0   :  { %v4902_v35 = vpop.f32.mrb[55].mxu0  ;;  %4933 = vmatprep.subr.bf16.mxu1 %v5355_v11  ;;  %v5215_v33 = vld [vmem:[%s6409_s10 + $0x18] sm:$0xff]  }
 0x7f1   :  { %v4388_v35 = vld [vmem:[%s6408_s9] ss:$0 sm:$0xff] }
 0x7f3   :  { %4934 = vmatpush3.bf16.msra.mxu1 %v5214_v31 }
 0x7f4   :  { %4935 = vmatprep.subr.bf16.mxu1 %v5355_v11 }
 0x7f5   :  { %v1892_v37 = vpop.f32.mrb[64].mxu1  ;;  %v1938_v38 = vpop.f32.mrb[56].mxu0 }
 0x7f6   :  { %v1998_v40 = vsel %vm153_vm3, %v1892_v37, 0.0  ;;  %v4907_v16 = vpop.f32.mrb[65].mxu1  ;;  %v4913_v43 = vpop.f32.mrb[57].mxu0  ;;  %v2000_v57 = vsel %vm153_vm3, %v1938_v38, 0.0 }
 0x7f7   :  { %v1999_v44 = vadd.f32 %v1998_v40, %v1997_v39  ;;  %v1895_v45 = vpop.f32.mrb[66].mxu1  ;;  %v1941_v46 = vpop.f32.mrb[58].mxu0  ;;  %4936 = vmatpush3.bf16.msra.mxu1 %v5215_v33 }
 0x7f8   :  { %v4908_v47 = vpop.f32.mrb[67].mxu1  ;;  %v4914_v49 = vpop.f32.mrb[59].mxu0  ;;  %4957 = vmatprep.subr.bf16.mxu1 %v5355_v11 }
 0x7f9   :  { %v2001_v48 = vadd.f32 %v2000_v57, %v1999_v44 }
 0x7fd   :  { %v1984_v42 = vpop.f32.mrb[68].mxu1 }
 0x7fe   :  { %v2002_v50 = vsel %vm153_vm3, %v1984_v42, 0.0  ;;  %v4919_v36 = vpop.f32.mrb[69].mxu1 }
 0x7ff   :  { %v2003_v52 = vadd.f32 %v2002_v50, %v2001_v48  ;;  %v1987_v41 = vpop.f32.mrb[70].mxu1 }
 0x800   :  { %v4920_v53 = vpop.f32.mrb[71].mxu1 }
 0x801   :  { %v2009_v51 = vadd.f32 %v2007_v21, %v2003_v52 }
 0x803   :  { %v2011_v54 = vadd.f32 %v2009_v51, %v5507_v61  ;;  %v5210_v61 = vld [vmem:[%s6407_s8] sm:$0xff]  }
 0x804   :  { %4922 = vmatpush3.bf16.msra.mxu0 %v5210_v61 }
 0x805   :  { %v2015_v55 = vsel %vm153_vm3, %v2011_v54, 0.0  ;;  %4923 = vmatprep.subr.bf16.mxu0 %v5355_v11 }
 0x806   :  { %2016 = vadd.xlane.f32.xlu1 %v2015_v55 }
 0x808   :  { %4924 = vmatpush3.bf16.msra.mxu0 %v5211_v59 }
 0x809   :  { %4941 = vmatprep.subr.bf16.mxu0 %v5355_v11 }
 0x856   :  { %v2014_v56 = vpop.xlane.xlu0 %2013 }
 0x857   :  { %v2018_v60 = vmul.f32 0.03125, %v2014_v56 }
 0x859   :  { %v2020_v62 = vsub.f32 %v2010_v27, %v2018_v60 }
 0x85b   :  { %v2022_v0 = vmul.f32 %v2020_v62, %v2020_v62 }
 0x85d   :  { %v2024_v2 = vsel %vm153_vm3, %v2022_v0, 0.0  ;;  %v2147_v0 = vsub.s32 3, %v5691_v30 }
 0x85e   :  { %2025 = vadd.xlane.f32.xlu0 %v2024_v2 }
 0x85f   :  { %v2148_v2 = vrot.slane %v5883_v19, %v2147_v0 }
 0x893   :  { %v2017_v3 = vpop.xlane.xlu1 %2016 }
 0x894   :  { %v2019_v5 = vmul.f32 0.03125, %v2017_v3 }
 0x896   :  { %v2021_v6 = vsub.f32 %v2011_v54, %v2019_v5 }
 0x898   :  { %v2023_v7 = vmul.f32 %v2021_v6, %v2021_v6 }
 0x89a   :  { %v2027_v8 = vsel %vm153_vm3, %v2023_v7, 0.0 }
 0x89b   :  { %2028 = vadd.xlane.f32.xlu0 %v2027_v8 }
 0x8eb   :  { %v2026_v25 = vpop.xlane.xlu0 %2025 }
 0x8ec   :  { %v2030_v1 = vmul.f32 0.03125, %v2026_v25 }
 0x8ee   :  { %v2032_v9 = vadd.f32 1e-12, %v2030_v1 }
 0x8f0   :  { %5274 = vrsqrt.f32 %v2032_v9 }
 0x8fa   :  { %v5275_v15 = vpop.eup %5274 }
 0x8fb   :  { %v2036_v18 = vmul.f32 %v5275_v15, %v2020_v62 }
 0x8fd   :  { %v2042_v22 = vmul.f32 %v2041_v17, %v2036_v18 }
 0x8ff   :  { %v2048_v4 = vadd.f32 %v2047_v24, %v2042_v22 }
 0x928   :  { %v2029_v10 = vpop.xlane.xlu0 %2028 }
 0x929   :  { %v2031_v12 = vmul.f32 0.03125, %v2029_v10 }
 0x92b   :  { %v2033_v13 = vadd.f32 1e-12, %v2031_v12 }
 0x92d   :  { %5276 = vrsqrt.f32 %v2033_v13 }
 0x937   :  { %v5277_v21 = vpop.eup %5276 }
 0x938   :  { %v2037_v23 = vmul.f32 %v5277_v21, %v2021_v6 }
 0x93a   :  { %v2043_v63 = vmul.f32 %v2041_v17, %v2037_v23 }
 0x93c   :  { %v2049_v26 = vadd.f32 %v2047_v24, %v2043_v63  ;;  %v5216_v63 = vld [vmem:[%s6404_s5 + $0x80] sm:$0xff]  }
 0x93e   :  { %v2050_v27 = vpack.c.bf16 %v2049_v26, %v2048_v4 }
 0x940   :  { %4926 = vmatmul.mubr.msk.bf16.vlgmr.msra.gmra.mrb[60].mxu0 %vm153_vm3, %v2050_v27  ;;  %v5219_v27 = vld [vmem:[%s6404_s5 + $0xa8] sm:$0xff]  }
 0x941   :  { %4945 = vmatprep.mubr.msk.bf16.mxu0 %vm5356_vm4, %v5355_v11  ;;  %4942 = vmatpush3.bf16.msra.mxu0 %v5216_v63 }
 0x942   :  { %4943 = vmatprep.subr.bf16.mxu0 %v5355_v11 }
 0xa13   :  { %v2111_v37 = vpop.f32.mrb[60].mxu0 }
 0xa14   :  { %v2112_v38 = vadd.f32 %v4388_v35, %v2111_v37  ;;  %v4927_v39 = vpop.f32.mrb[61].mxu0 }
 0xa15   :  { %v2114_v40 = vpop.f32.mrb[62].mxu0  ;;  %v2253_v39 = vsub.s32 5, %v5691_v30 }
 0xa16   :  { %v2118_v16 = vmul.f32 %v2112_v38, %v2112_v38  ;;  %v2115_v43 = vadd.f32 %v4388_v35, %v2114_v40  ;;  %v4928_v44 = vpop.f32.mrb[63].mxu0 }
 0xa17   :  { %v2254_v44 = vrot.slane %v5883_v19, %v2253_v39 }
 0xa18   :  { %v2120_v45 = vmul.f32 %v2118_v16, %v2112_v38  ;;  %v2119_v46 = vmul.f32 %v2115_v43, %v2115_v43 }
 0xa1a   :  { %v2122_v57 = vmul.f32 0.044715, %v2120_v45  ;;  %v2121_v47 = vmul.f32 %v2119_v46, %v2115_v43 }
 0xa1c   :  { %v2124_v49 = vadd.f32 %v2122_v57, %v2112_v38  ;;  %v2123_v48 = vmul.f32 0.044715, %v2121_v47 }
 0xa1e   :  { %v2126_v42 = vmul.f32 0.7978846, %v2124_v49  ;;  %v2125_v50 = vadd.f32 %v2123_v48, %v2115_v43  ;;  %v5220_v49 = vld [vmem:[%s6404_s5 + $0x90] sm:$0xff]   ;;  %v5221_v48 = vld [vmem:[%s6404_s5 + $0xc0] sm:$0xff]  }
 0xa20   :  { %5278 = vtanh.f32 %v2126_v42  ;;  %v2127_v36 = vmul.f32 0.7978846, %v2125_v50 }
 0xa22   :  { %5280 = vtanh.f32 %v2127_v36  ;;  %v5223_v36 = vld [vmem:[%s6404_s5 + $0xc8] sm:$0xff]  }
 0xa2a   :  { %v5279_v52 = vpop.eup %5278 }
 0xa2b   :  { %v2130_v41 = vadd.f32 1.0, %v5279_v52 }
 0xa2c   :  { %v5281_v53 = vpop.eup %5280 }
 0xa2d   :  { %v2132_v51 = vmul.f32 0.5, %v2130_v41  ;;  %v2131_v54 = vadd.f32 1.0, %v5281_v53  ;;  %v5224_v41 = vld [vmem:[%s6404_s5 + $0xb0] sm:$0xff]   ;;  %v5225_v53 = vld [vmem:[%s6404_s5 + $0xe0] sm:$0xff]  }
 0xa2f   :  { %v2133_v55 = vmul.f32 0.5, %v2131_v54  ;;  %v2134_v56 = vmul.f32 %v2132_v51, %v2112_v38  ;;  %v2247_v38 = vsub.s32 4, %v5691_v30  ;;  %v5226_v54 = vld [vmem:[%s6404_s5 + $0xb8] sm:$0xff]  }
 0xa31   :  { %v2135_v60 = vmul.f32 %v2133_v55, %v2115_v43  ;;  %v2248_v40 = vrot.slane %v5883_v19, %v2247_v38  ;;  %v5222_v19 = vld [vmem:[%s6404_s5 + $0x98] sm:$0xff]   ;;  %v5227_v55 = vld [vmem:[%s6404_s5 + $0xe8] sm:$0xff]  }
 0xa33   :  { %v2136_v62 = vpack.c.bf16 %v2135_v60, %v2134_v56  ;;  %v5228_v56 = vld [vmem:[%s6404_s5 + $0xd0] sm:$0xff]   ;;  %v5229_v60 = vld [vmem:[%s6404_s5 + $0xd8] sm:$0xff]  }
 0xa35   :  { %4938 = vmatmul.mubr.msk.bf16.vlgmr.msra.gmra.mrb[72].mxu1 %vm69_vm0, %v2136_v62  ;;  %v5230_v62 = vld [vmem:[%s6404_s5 + $0xf0] sm:$0xff]  }
 0xa36   :  { %4961 = vmatprep.mubr.msk.bf16.mxu1 %vm5356_vm4, %v5355_v11 }
 0xb08   :  { %v2210_v3 = vpop.f32.mrb[72].mxu1 }
 0xb09   :  { %v2211_v5 = vadd.f32 %v2210_v3, %v2148_v2  ;;  %v4939_v6 = vpop.f32.mrb[73].mxu1  ;;  %v4438_v3 = vld [vmem:[%s6405_s6 + $0x8] ss:$0 sm:$0xff] }
 0xb0a   :  { %v2213_v7 = vpop.f32.mrb[74].mxu1  ;;  %v4440_v6 = vld [vmem:[%s6405_s6 + $0xa] ss:$0 sm:$0xff] }
 0xb0b   :  { %v2214_v8 = vadd.f32 %v2213_v7, %v2148_v2  ;;  %v4940_v61 = vpop.f32.mrb[75].mxu1  ;;  %v2217_v59 = vadd.f32 %v2211_v5, %v2048_v4  ;;  %v5217_v4 = vld [vmem:[%s6404_s5 + $0xa0] sm:$0xff]   ;;  %v5231_v2 = vld [vmem:[%s6404_s5 + $0xf8] sm:$0xff]  }
 0xb0c   :  { %4958 = vmatpush3.bf16.msra.mxu1 %v5217_v4 }
 0xb0d   :  { %v2219_v25 = vsel %vm153_vm3, %v2217_v59, 0.0  ;;  %v2218_v1 = vadd.f32 %v2214_v8, %v2049_v26  ;;  %4959 = vmatprep.subr.bf16.mxu1 %v5355_v11  ;;  %v5218_v26 = vld [vmem:[%s6404_s5 + $0x88] sm:$0xff]  }
 0xb0e   :  { %2220 = vadd.xlane.f32.xlu1 %v2219_v25  ;;  %4944 = vmatpush3.bf16.msra.mxu0 %v5218_v26 }
 0xb0f   :  { %v2222_v9 = vsel %vm153_vm3, %v2218_v1, 0.0  ;;  %4949 = vmatprep.subr.bf16.mxu0 %v5355_v11 }
 0xb10   :  { %2223 = vadd.xlane.f32.xlu0 %v2222_v9  ;;  %4960 = vmatpush3.bf16.msra.mxu1 %v5219_v27 }
 0xb11   :  { %4973 = vmatprep.subr.bf16.mxu1 %v5355_v11 }
 0xb9b   :  { %v2221_v10 = vpop.xlane.xlu1 %2220 }
 0xb9c   :  { %v2225_v12 = vmul.f32 0.03125, %v2221_v10 }
 0xb9d   :  { %v2224_v13 = vpop.xlane.xlu0 %2223 }
 0xb9e   :  { %v2227_v15 = vsub.f32 %v2217_v59, %v2225_v12  ;;  %v2226_v17 = vmul.f32 0.03125, %v2224_v13 }
 0xba0   :  { %v2228_v18 = vsub.f32 %v2218_v1, %v2226_v17  ;;  %v2229_v21 = vmul.f32 %v2227_v15, %v2227_v15 }
 0xba2   :  { %v2231_v22 = vsel %vm153_vm3, %v2229_v21, 0.0  ;;  %v2230_v23 = vmul.f32 %v2228_v18, %v2228_v18  ;;  %v4442_v21 = vld [vmem:[%s6405_s6 + $0xc] ss:$0 sm:$0xff] }
 0xba3   :  { %2232 = vadd.xlane.f32.xlu1 %v2231_v22 }
 0xba4   :  { %v2234_v24 = vsel %vm153_vm3, %v2230_v23, 0.0 }
 0xba5   :  { %2235 = vadd.xlane.f32.xlu0 %v2234_v24 }
 0xc30   :  { %v2233_v28 = vpop.xlane.xlu1 %2232 }
 0xc31   :  { %v2237_v29 = vmul.f32 0.03125, %v2233_v28 }
 0xc32   :  { %v2236_v31 = vpop.xlane.xlu0 %2235 }
 0xc33   :  { %v2239_v33 = vadd.f32 1e-12, %v2237_v29  ;;  %v2238_v35 = vmul.f32 0.03125, %v2236_v31 }
 0xc35   :  { %5282 = vrsqrt.f32 %v2239_v33  ;;  %v2240_v37 = vadd.f32 1e-12, %v2238_v35  ;;  %v4441_v33 = vld [vmem:[%s6405_s6 + $0xb] ss:$0 sm:$0xff]  ;;  %v4444_v35 = vld [vmem:[%s6405_s6 + $0xe] ss:$0 sm:$0xff] }
 0xc37   :  { %5284 = vrsqrt.f32 %v2240_v37 }
 0xc3f   :  { %v5283_v16 = vpop.eup %5282 }
 0xc40   :  { %v2243_v43 = vmul.f32 %v5283_v16, %v2227_v15  ;;  %v4439_v15 = vld [vmem:[%s6405_s6 + $0x9] ss:$0 sm:$0xff] }
 0xc41   :  { %v5285_v45 = vpop.eup %5284 }
 0xc42   :  { %v2249_v46 = vmul.f32 %v2248_v40, %v2243_v43  ;;  %v2244_v57 = vmul.f32 %v5285_v45, %v2228_v18 }
 0xc44   :  { %v5971_v47 = vadd.f32 %v2254_v44, %v2249_v46  ;;  %v2250_v42 = vmul.f32 %v2248_v40, %v2244_v57 }
 0xc46   :  { %v2259_v50 = vpack.c.bf16 %v5971_v47, %v5971_v47  ;;  %v5991_v52 = vadd.f32 %v2254_v44, %v2250_v42 }
 0xc48   :  { %4946 = vmatmul.mubr.msk.bf16.vlgmr.msra.gmra.mrb[64].mxu0 %vm153_vm3, %v2259_v50  ;;  %4962 = vmatmul.mubr.msk.bf16.vlgmr.msra.gmra.mrb[76].mxu1 %vm153_vm3, %v2259_v50  ;;  %v2260_v51 = vpack.c.bf16 %v5991_v52, %v5991_v52 }
 0xc49   :  { %4950 = vmatpush3.bf16.msra.mxu0 %v5220_v49  ;;  %4974 = vmatpush3.bf16.msra.mxu1 %v5221_v48 }
 0xc4a   :  { %4951 = vmatprep.subr.bf16.mxu0 %v5355_v11  ;;  %4975 = vmatprep.subr.bf16.mxu1 %v5355_v11 }
 0xc4b   :  { %4953 = vmatprep.mubr.msk.bf16.mxu0 %vm5356_vm4, %v5355_v11  ;;  %4977 = vmatprep.mubr.msk.bf16.mxu1 %vm5356_vm4, %v5355_v11 }
 0xc4d   :  { %4952 = vmatpush3.bf16.msra.mxu0 %v5222_v19  ;;  %4976 = vmatpush3.bf16.msra.mxu1 %v5223_v36  ;;  %v4443_v36 = vld [vmem:[%s6405_s6 + $0xd] ss:$0 sm:$0xff] }
 0xc4e   :  { %4965 = vmatprep.subr.bf16.mxu0 %v5355_v11  ;;  %4989 = vmatprep.subr.bf16.mxu1 %v5355_v11 }
 0xc50   :  { %4954 = vmatmul.mubr.msk.bf16.vlgmr.msra.gmra.mrb[68].mxu0 %vm153_vm3, %v2259_v50  ;;  %4978 = vmatmul.mubr.msk.bf16.vlgmr.msra.gmra.mrb[80].mxu1 %vm153_vm3, %v2260_v51 }
 0xc51   :  { %4966 = vmatpush3.bf16.msra.mxu0 %v5224_v41  ;;  %4990 = vmatpush3.bf16.msra.mxu1 %v5225_v53 }
 0xc52   :  { %4967 = vmatprep.subr.bf16.mxu0 %v5355_v11  ;;  %4991 = vmatprep.subr.bf16.mxu1 %v5355_v11 }
 0xc53   :  { %4969 = vmatprep.mubr.msk.bf16.mxu0 %vm5356_vm4, %v5355_v11  ;;  %4993 = vmatprep.mubr.msk.bf16.mxu1 %vm5356_vm4, %v5355_v11 }
 0xc55   :  { %4968 = vmatpush3.bf16.msra.mxu0 %v5226_v54  ;;  %4992 = vmatpush3.bf16.msra.mxu1 %v5227_v55 }
 0xc56   :  { %4981 = vmatprep.subr.bf16.mxu0 %v5355_v11  ;;  %5005 = vmatprep.subr.bf16.mxu1 %v5355_v11 }
 0xc58   :  { %4970 = vmatmul.mubr.msk.bf16.vlgmr.msra.gmra.mrb[72].mxu0 %vm153_vm3, %v2259_v50  ;;  %4994 = vmatmul.mubr.msk.bf16.vlgmr.msra.gmra.mrb[84].mxu1 %vm153_vm3, %v2260_v51 }
 0xc59   :  { %4982 = vmatpush3.bf16.msra.mxu0 %v5228_v56  ;;  %4985 = vmatprep.mubr.msk.bf16.mxu0 %vm5356_vm4, %v5355_v11 }
 0xc5a   :  { %4983 = vmatprep.subr.bf16.mxu0 %v5355_v11  ;;  %5007 = vmatprep.mubr.msk.bf16.mxu1 %vm5356_vm4, %v5355_v11 }
 0xc5d   :  { %4984 = vmatpush3.bf16.msra.mxu0 %v5229_v60  ;;  %v4445_v60 = vld [vmem:[%s6405_s6 + $0xf] ss:$0 sm:$0xff] }
 0xc5e   :  { %4997 = vmatprep.subr.bf16.mxu0 %v5355_v11 }
 0xc60   :  { %4986 = vmatmul.mubr.msk.bf16.vlgmr.msra.gmra.mrb[76].mxu0 %vm153_vm3, %v2260_v51 }
 0xc61   :  { %4998 = vmatpush3.bf16.msra.mxu0 %v5230_v62  ;;  %5001 = vmatprep.mubr.msk.bf16.mxu0 %vm5356_vm4, %v5355_v11 }
 0xc62   :  { %4999 = vmatprep.subr.bf16.mxu0 %v5355_v11 }
 0xc65   :  { %5000 = vmatpush3.bf16.msra.mxu0 %v5231_v2 }
 0xc66   :  { %5011 = vmatprep.subr.bf16.mxu0 %v5355_v11 }
 0xc68   :  { %5002 = vmatmul.mubr.msk.bf16.vlgmr.msra.gmra.mrb[80].mxu0 %vm153_vm3, %v2260_v51 }
 0xc69   :  { %5013 = vmatprep.mubr.msk.bf16.mxu0 %vm5356_vm4, %v5355_v11 }
 0xd1b   :  { %v2400_v5 = vpop.f32.mrb[64].mxu0  ;;  %v2504_v7 = vpop.f32.mrb[76].mxu1 }
 0xd1c   :  { %v2401_v8 = vadd.f32 %v4438_v3, %v2400_v5  ;;  %v4947_v61 = vpop.f32.mrb[65].mxu0  ;;  %v4963_v59 = vpop.f32.mrb[77].mxu1  ;;  %v2505_v10 = vadd.f32 %v4440_v6, %v2504_v7 }
 0xd1d   :  { %v2403_v25 = vpop.f32.mrb[66].mxu0  ;;  %v2507_v1 = vpop.f32.mrb[78].mxu1 }
 0xd1e   :  { %v6057_v9 = vpack.c.bf16 %v2401_v8, %v2401_v8  ;;  %v4948_v12 = vpop.f32.mrb[67].mxu0  ;;  %v4964_v13 = vpop.f32.mrb[79].mxu1  ;;  %v6064_v17 = vpack.c.bf16 %v2505_v10, %v2505_v10 }
 0xd20   :  { %2782 = vrot.lane.b32.xlu1 %v6057_v9, %s5357_s2 }
 0xd23   :  { %v2452_v18 = vpop.f32.mrb[68].mxu0  ;;  %v2611_v22 = vpop.f32.mrb[80].mxu1 }
 0xd24   :  { %v2453_v23 = vadd.f32 %v4439_v15, %v2452_v18  ;;  %v4955_v24 = vpop.f32.mrb[69].mxu0  ;;  %2880 = vrot.lane.b32.xlu1 %v6064_v17, %s5357_s2  ;;  %v4979_v63 = vpop.f32.mrb[81].mxu1  ;;  %v2612_v28 = vadd.f32 %v4442_v21, %v2611_v22 }
 0xd25   :  { %v2455_v4 = vpop.f32.mrb[70].mxu0  ;;  %v2614_v26 = vpop.f32.mrb[82].mxu1 }
 0xd26   :  { %v2774_v27 = vpack.c.bf16 %v2453_v23, %v2453_v23  ;;  %v4956_v29 = vpop.f32.mrb[71].mxu0  ;;  %v4980_v31 = vpop.f32.mrb[83].mxu1  ;;  %v6078_v37 = vpack.c.bf16 %v2612_v28, %v2612_v28 }
 0xd28   :  { %2831 = vrot.lane.b32.xlu0 %v2774_v27, %s5357_s2 }
 0xd2b   :  { %v2556_v40 = vpop.f32.mrb[72].mxu0  ;;  %v2715_v16 = vpop.f32.mrb[84].mxu1 }
 0xd2c   :  { %v2557_v43 = vadd.f32 %v4441_v33, %v2556_v40  ;;  %v2716_v44 = vadd.f32 %v4444_v35, %v2715_v16  ;;  %v4971_v45 = vpop.f32.mrb[73].mxu0  ;;  %2978 = vrot.lane.b32.xlu0 %v6078_v37, %s5357_s2  ;;  %v4995_v46 = vpop.f32.mrb[85].mxu1 }
 0xd2d   :  { %v2559_v57 = vpop.f32.mrb[74].mxu0  ;;  %v2718_v49 = vpop.f32.mrb[86].mxu1 }
 0xd2e   :  { %v6082_v48 = vpack.c.bf16 %v2557_v43, %v2557_v43  ;;  %v6084_v42 = vpack.c.bf16 %v2716_v44, %v2716_v44  ;;  %v4972_v50 = vpop.f32.mrb[75].mxu0  ;;  %v4996_v19 = vpop.f32.mrb[87].mxu1 }
 0xd30   :  { %2929 = vrot.lane.b32.xlu1 %v6082_v48, %s5357_s2  ;;  %3076 = vrot.lane.b32.xlu0 %v6084_v42, %s5357_s2 }
 0xd33   :  { %v2663_v41 = vpop.f32.mrb[76].mxu0 }
 0xd34   :  { %v2664_v53 = vadd.f32 %v4443_v36, %v2663_v41  ;;  %v4987_v51 = vpop.f32.mrb[77].mxu0  ;;  %3269 = vrot.lane.b32.xlu0 %v6057_v9, %s5358_s24 }
 0xd35   :  { %v2666_v54 = vpop.f32.mrb[78].mxu0 }
 0xd36   :  { %v6095_v55 = vpack.c.bf16 %v2664_v53, %v2664_v53  ;;  %v4988_v56 = vpop.f32.mrb[79].mxu0 }
 0xd38   :  { %3027 = vrot.lane.b32.xlu1 %v6095_v55, %s5357_s2 }
 0xd3b   :  { %v2767_v62 = vpop.f32.mrb[80].mxu0 }
 0xd3c   :  { %v2768_v2 = vadd.f32 %v4445_v60, %v2767_v62  ;;  %v5003_v3 = vpop.f32.mrb[81].mxu0 }
 0xd3d   :  { %v2770_v5 = vpop.f32.mrb[82].mxu0 }
 0xd3e   :  { %v6102_v6 = vpack.c.bf16 %v2768_v2, %v2768_v2  ;;  %v5004_v7 = vpop.f32.mrb[83].mxu0 }
 0xd40   :  { %3125 = vrot.lane.b32.xlu1 %v6102_v6, %s5357_s2 }
 0xd44   :  { %3317 = vrot.lane.b32.xlu1 %v2774_v27, %s5358_s24 }
 0xd92   :  { %v2783_v8 = vpop.permute.xlu1 %2782 }
 0xd93   :  { %v2788_v61 = vsel %vm735_vm5, %v2783_v8, 0 }
 0xd94   :  { %5006 = vmatpush3.bf16.xpose.msra.mxu1 %v2788_v61 }
 0xd95   :  { %5017 = vmatprep.subr.bf16.mxu1 %v5355_v11 }
 0xd96   :  { %v2881_v59 = vpop.permute.xlu1 %2880 }
 0xd97   :  { %v2886_v1 = vsel %vm735_vm5, %v2881_v59, 0 }
 0xd9a   :  { %v2832_v25 = vpop.permute.xlu0 %2831 }
 0xd9b   :  { %v2837_v10 = vsel %vm735_vm5, %v2832_v25, 0  ;;  %5008 = vmatmul.mubr.msk.bf16.vlgmr.msra.gmra.mrb[88].mxu1 %vm735_vm5, %v6057_v9 }
 0xd9c   :  { %5012 = vmatpush3.bf16.xpose.msra.mxu0 %v2837_v10  ;;  %5018 = vmatpush3.bf16.xpose.msra.mxu1 %v2886_v1 }
 0xd9d   :  { %5019 = vmatprep.mubr.msk.bf16.mxu1 %vm5356_vm4, %v5355_v11  ;;  %5023 = vmatprep.subr.bf16.mxu0 %v5355_v11 }
 0xd9e   :  { %5029 = vmatprep.subr.bf16.mxu1 %v5355_v11  ;;  %v2979_v12 = vpop.permute.xlu0 %2978 }
 0xd9f   :  { %v2984_v15 = vsel %vm735_vm5, %v2979_v12, 0 }
 0xda2   :  { %v2930_v13 = vpop.permute.xlu1 %2929  ;;  %v3077_v9 = vpop.permute.xlu0 %3076 }
 0xda3   :  { %v2935_v18 = vsel %vm735_vm5, %v2930_v13, 0  ;;  %5014 = vmatmul.mubr.msk.bf16.vlgmr.msra.gmra.mrb[84].mxu0 %vm735_vm5, %v2774_v27  ;;  %5020 = vmatmul.mubr.msk.bf16.vlgmr.msra.gmra.mrb[92].mxu1 %vm735_vm5, %v6064_v17  ;;  %v3082_v22 = vsel %vm735_vm5, %v3077_v9, 0 }
 0xda4   :  { %5024 = vmatpush3.bf16.xpose.msra.mxu0 %v2935_v18  ;;  %5030 = vmatpush3.bf16.xpose.msra.mxu1 %v2984_v15 }
 0xda5   :  { %5025 = vmatprep.mubr.msk.bf16.mxu0 %vm5356_vm4, %v5355_v11  ;;  %5031 = vmatprep.mubr.msk.bf16.mxu1 %vm5356_vm4, %v5355_v11 }
 0xda6   :  { %5035 = vmatprep.subr.bf16.mxu0 %v5355_v11  ;;  %5041 = vmatprep.subr.bf16.mxu1 %v5355_v11  ;;  %v3270_v24 = vpop.permute.xlu0 %3269 }
 0xda7   :  { %v3275_v4 = vsel %vm1226_vm6, %v3270_v24, 0 }
 0xdaa   :  { %v3028_v21 = vpop.permute.xlu1 %3027 }
 0xdab   :  { %v3033_v23 = vsel %vm735_vm5, %v3028_v21, 0  ;;  %5026 = vmatmul.mubr.msk.bf16.vlgmr.msra.gmra.mrb[88].mxu0 %vm735_vm5, %v6082_v48  ;;  %5032 = vmatmul.mubr.msk.bf16.vlgmr.msra.gmra.mrb[96].mxu1 %vm735_vm5, %v6078_v37 }
 0xdac   :  { %5036 = vmatpush3.bf16.xpose.msra.mxu0 %v3033_v23  ;;  %5042 = vmatpush3.bf16.xpose.msra.mxu1 %v3082_v22 }
 0xdad   :  { %5037 = vmatprep.mubr.msk.bf16.mxu0 %vm5356_vm4, %v5355_v11  ;;  %5043 = vmatprep.mubr.msk.bf16.mxu1 %vm5356_vm4, %v5355_v11 }
 0xdae   :  { %5047 = vmatprep.subr.bf16.mxu0 %v5355_v11  ;;  %5053 = vmatprep.subr.bf16.mxu1 %v5355_v11 }
 0xdb2   :  { %v3126_v63 = vpop.permute.xlu1 %3125 }
 0xdb3   :  { %v3131_v26 = vsel %vm735_vm5, %v3126_v63, 0  ;;  %5038 = vmatmul.mubr.msk.bf16.vlgmr.msra.gmra.mrb[92].mxu0 %vm735_vm5, %v6095_v55  ;;  %5044 = vmatmul.mubr.msk.bf16.vlgmr.msra.gmra.mrb[100].mxu1 %vm735_vm5, %v6084_v42 }
 0xdb4   :  { %5048 = vmatpush3.bf16.xpose.msra.mxu0 %v3131_v26  ;;  %5054 = vmatpush3.bf16.msra.mxu1 %v3275_v4 }
 0xdb5   :  { %5049 = vmatprep.mubr.msk.bf16.mxu0 %vm5356_vm4, %v5355_v11  ;;  %5059 = vmatprep.subr.bf16.mxu0 %v5355_v11 }
 0xdb6   :  { %5055 = vmatprep.mubr.msk.bf16.mxu1 %vm5356_vm4, %v5355_v11  ;;  %5065 = vmatprep.subr.bf16.mxu1 %v5355_v11  ;;  %v3318_v27 = vpop.permute.xlu1 %3317 }
 0xdb7   :  { %v3323_v28 = vsel %vm1226_vm6, %v3318_v27, 0 }
 0xdbb   :  { %5050 = vmatmul.mubr.msk.bf16.vlgmr.msra.gmra.mrb[96].mxu0 %vm735_vm5, %v6102_v6 }
 0xdbc   :  { %5060 = vmatpush3.bf16.msra.mxu0 %v3323_v28  ;;  %5061 = vmatprep.mubr.msk.bf16.mxu0 %vm5356_vm4, %v5355_v11 }
 0xdbd   :  { %5071 = vmatprep.subr.bf16.mxu0 %v5355_v11 }
 0xe6e   :  { %v2824_v29 = vpop.f32.mrb[88].mxu1 }
 0xe6f   :  { %v2825_v31 = vadd.f32 %v2824_v29, %v5697_v34  ;;  %v5009_v33 = vpop.f32.mrb[89].mxu1 }
 0xe70   :  { %v2827_v35 = vpop.f32.mrb[90].mxu1 }
 0xe71   :  { %v5010_v40 = vpop.f32.mrb[91].mxu1  ;;  %v3173_v16 = vsel %vm735_vm5, %v2825_v31, -inf }
 0xe72   :  { %3174 = vmax.xlane.f32.xlu0 %v3173_v16 }
 0xe76   :  { %v2873_v43 = vpop.f32.mrb[84].mxu0  ;;  %v2922_v44 = vpop.f32.mrb[92].mxu1 }
 0xe77   :  { %v2874_v45 = vadd.f32 %v2873_v43, %v5697_v34  ;;  %v2923_v46 = vadd.f32 %v2922_v44, %v5697_v34  ;;  %v5015_v57 = vpop.f32.mrb[85].mxu0  ;;  %v5021_v49 = vpop.f32.mrb[93].mxu1 }
 0xe78   :  { %v2876_v50 = vpop.f32.mrb[86].mxu0  ;;  %v2925_v19 = vpop.f32.mrb[94].mxu1 }
 0xe79   :  { %v5016_v36 = vpop.f32.mrb[87].mxu0  ;;  %v5022_v41 = vpop.f32.mrb[95].mxu1  ;;  %v3176_v53 = vsel %vm735_vm5, %v2874_v45, -inf  ;;  %v3179_v51 = vsel %vm735_vm5, %v2923_v46, -inf }
 0xe7a   :  { %3177 = vmax.xlane.f32.xlu1 %v3176_v53  ;;  %3180 = vmax.xlane.f32.xlu0 %v3179_v51 }
 0xe7e   :  { %v2971_v54 = vpop.f32.mrb[88].mxu0  ;;  %v3020_v56 = vpop.f32.mrb[96].mxu1 }
 0xe7f   :  { %v2972_v60 = vadd.f32 %v2971_v54, %v5697_v34  ;;  %v6166_v62 = vadd.f32 %v3020_v56, %v5712_v58  ;;  %v5027_v2 = vpop.f32.mrb[89].mxu0  ;;  %v5033_v3 = vpop.f32.mrb[97].mxu1 }
 0xe80   :  { %v2974_v5 = vpop.f32.mrb[90].mxu0  ;;  %v3023_v7 = vpop.f32.mrb[98].mxu1 }
 0xe81   :  { %v5028_v8 = vpop.f32.mrb[91].mxu0  ;;  %v5034_v61 = vpop.f32.mrb[99].mxu1  ;;  %v3182_v59 = vsel %vm735_vm5, %v2972_v60, -inf  ;;  %v3185_v25 = vsel %vm735_vm5, %v6166_v62, -inf }
 0xe82   :  { %3183 = vmax.xlane.f32.xlu0 %v3182_v59  ;;  %3186 = vmax.xlane.f32.xlu1 %v3185_v25 }
 0xe86   :  { %v3069_v1 = vpop.f32.mrb[92].mxu0  ;;  %v3118_v10 = vpop.f32.mrb[100].mxu1 }
 0xe87   :  { %v3070_v34 = vadd.f32 %v3069_v1, %v5712_v58  ;;  %v3119_v12 = vadd.f32 %v3118_v10, %v5712_v58  ;;  %v5039_v13 = vpop.f32.mrb[93].mxu0  ;;  %v5045_v15 = vpop.f32.mrb[101].mxu1 }
 0xe88   :  { %v3072_v18 = vpop.f32.mrb[94].mxu0  ;;  %v3121_v9 = vpop.f32.mrb[102].mxu1 }
 0xe89   :  { %v5040_v21 = vpop.f32.mrb[95].mxu0  ;;  %v5046_v22 = vpop.f32.mrb[103].mxu1  ;;  %v3188_v23 = vsel %vm735_vm5, %v3070_v34, -inf  ;;  %v3191_v24 = vsel %vm735_vm5, %v3119_v12, -inf }
 0xe8a   :  { %3189 = vmax.xlane.f32.xlu0 %v3188_v23  ;;  %3192 = vmax.xlane.f32.xlu1 %v3191_v24 }
 0xe8e   :  { %v3167_v63 = vpop.f32.mrb[96].mxu0 }
 0xe8f   :  { %v3168_v4 = vadd.f32 %v3167_v63, %v5712_v58  ;;  %v5051_v26 = vpop.f32.mrb[97].mxu0 }
 0xe90   :  { %v3170_v27 = vpop.f32.mrb[98].mxu0 }
 0xe91   :  { %v5052_v28 = vpop.f32.mrb[99].mxu0  ;;  %v3194_v29 = vsel %vm735_vm5, %v3168_v4, -inf }
 0xe92   :  { %3195 = vmax.xlane.f32.xlu0 %v3194_v29 }
 0xe9b   :  { %3413 = vrot.lane.b32.xlu1 %v6082_v48, %s5358_s24 }
 0xea8   :  { %3365 = vrot.lane.b32.xlu0 %v6064_v17, %s5358_s24 }
 0xeff   :  { %v3175_v33 = vpop.xlane.xlu0 %3174 }
 0xf00   :  { %v3197_v35 = vsub.f32 %v2825_v31, %v3175_v33 }
 0xf02   :  { %v3205_v40 = vmul.f32 1.442695, %v3197_v35 }
 0xf04   :  { %5286 = vpow2.f32 %v3205_v40 }
 0xf07   :  { %v3178_v16 = vpop.xlane.xlu1 %3177  ;;  %v3181_v43 = vpop.xlane.xlu0 %3180 }
 0xf08   :  { %v3198_v44 = vsub.f32 %v2874_v45, %v3178_v16  ;;  %v3199_v58 = vsub.f32 %v2923_v46, %v3181_v43 }
 0xf0a   :  { %v3207_v57 = vmul.f32 1.442695, %v3198_v44  ;;  %v3209_v49 = vmul.f32 1.442695, %v3199_v58 }
 0xf0c   :  { %5288 = vpow2.f32 %v3207_v57 }
 0xf0d   :  { %5290 = vpow2.f32 %v3209_v49 }
 0xf0e   :  { %v5287_v50 = vpop.eup %5286 }
 0xf0f   :  { %v3184_v19 = vpop.xlane.xlu0 %3183  ;;  %v3221_v36 = vsel %vm735_vm5, %v5287_v50, 0.0  ;;  %v3187_v54 = vpop.xlane.xlu1 %3186 }
 0xf10   :  { %v3200_v48 = vsub.f32 %v2972_v60, %v3184_v19  ;;  %3222 = vadd.xlane.f32.xlu1 %v3221_v36  ;;  %v3201_v56 = vsub.f32 %v6166_v62, %v3187_v54 }
 0xf12   :  { %v3211_v41 = vmul.f32 1.442695, %v3200_v48  ;;  %v3213_v3 = vmul.f32 1.442695, %v3201_v56 }
 0xf14   :  { %5292 = vpow2.f32 %v3211_v41 }
 0xf15   :  { %5294 = vpow2.f32 %v3213_v3 }
 0xf16   :  { %v5289_v17 = vpop.eup %5288 }
 0xf17   :  { %v5291_v31 = vpop.eup %5290  ;;  %v3224_v53 = vsel %vm735_vm5, %v5289_v17, 0.0  ;;  %v3190_v60 = vpop.xlane.xlu0 %3189 }
 0xf18   :  { %3225 = vadd.xlane.f32.xlu0 %v3224_v53  ;;  %v3227_v45 = vsel %vm735_vm5, %v5291_v31, 0.0  ;;  %v3193_v2 = vpop.xlane.xlu1 %3192  ;;  %v3202_v8 = vsub.f32 %v3070_v34, %v3190_v60 }
 0xf19   :  { %3228 = vadd.xlane.f32.xlu1 %v3227_v45  ;;  %v3203_v5 = vsub.f32 %v3119_v12, %v3193_v2 }
 0xf1a   :  { %v3215_v25 = vmul.f32 1.442695, %v3202_v8 }
 0xf1b   :  { %v3217_v61 = vmul.f32 1.442695, %v3203_v5 }
 0xf1c   :  { %v3414_v18 = vpop.permute.xlu1 %3413 }
 0xf1d   :  { %5296 = vpow2.f32 %v3217_v61  ;;  %v3419_v16 = vsel %vm1226_vm6, %v3414_v18, 0 }
 0xf1e   :  { %v6184_v46 = vpop.eup %5292  ;;  %5298 = vpow2.f32 %v3215_v25  ;;  %v4486_v25 = vld [vmem:[%s6406_s7 + $0x20] sm:$0xf] }
 0xf1f   :  { %v3230_v51 = vsel %vm735_vm5, %v6184_v46, 0.0  ;;  %v3196_v7 = vpop.xlane.xlu0 %3195 }
 0xf20   :  { %3231 = vadd.xlane.f32.xlu0 %v3230_v51  ;;  %v3204_v59 = vsub.f32 %v3168_v4, %v3196_v7 }
 0xf22   :  { %v3219_v1 = vmul.f32 1.442695, %v3204_v59 }
 0xf23   :  { %v3366_v21 = vpop.permute.xlu0 %3365 }
 0xf24   :  { %5300 = vpow2.f32 %v3219_v1  ;;  %v3371_v26 = vsel %vm1226_vm6, %v3366_v21, 0  ;;  %v3674_v1 = vsel %vm1226_vm6, %v4486_v25, 0  ;;  %v4490_v21 = vld [vmem:[%s6406_s7 + $0x30] sm:$0xf] }
 0xf2a   :  { %3509 = vrot.lane.b32.xlu1 %v6095_v55, %s5358_s24  ;;  %v6193_v55 = vpop.eup %5294 }
 0xf2b   :  { %v6197_v62 = vpop.eup %5296 }
 0xf2c   :  { %v6199_v10 = vpop.eup %5298  ;;  %v3239_v34 = vsel %vm735_vm5, %v6197_v62, 0.0 }
 0xf2d   :  { %v3236_v13 = vsel %vm735_vm5, %v6199_v10, 0.0 }
 0xf2e   :  { %v6203_v12 = vpop.eup %5300 }
 0xf2f   :  { %v3242_v15 = vsel %vm735_vm5, %v6203_v12, 0.0 }
 0xf36   :  { %3461 = vrot.lane.b32.xlu0 %v6078_v37, %s5358_s24  ;;  %v3233_v37 = vsel %vm735_vm5, %v6193_v55, 0.0 }
 0xf4e   :  { %3234 = vadd.xlane.f32.xlu1 %v3233_v37 }
 0xf52   :  { %3240 = vadd.xlane.f32.xlu1 %v3239_v34 }
 0xf55   :  { %3237 = vadd.xlane.f32.xlu0 %v3236_v13 }
 0xf56   :  { %3243 = vadd.xlane.f32.xlu1 %v3242_v15 }
 0xf67   :  { %3605 = vrot.lane.b32.xlu1 %v6102_v6, %s5358_s24 }
 0xf6b   :  { %3557 = vrot.lane.b32.xlu0 %v6084_v42, %s5358_s24 }
 0xf9d   :  { %v3223_v9 = vpop.xlane.xlu1 %3222 }
 0xf9e   :  { %5302 = vrcp.f32 %v3223_v9  ;;  %v4489_v9 = vld [vmem:[%s6406_s7 + $0x2c] sm:$0xf] }
 0xfa5   :  { %v3226_v22 = vpop.xlane.xlu0 %3225 }
 0xfa6   :  { %5304 = vrcp.f32 %v3226_v22  ;;  %v3229_v23 = vpop.xlane.xlu1 %3228 }
 0xfa7   :  { %5306 = vrcp.f32 %v3229_v23 }
 0xfa8   :  { %v5303_v24 = vpop.eup %5302 }
 0xfa9   :  { %v3253_v63 = vmul.f32 %v5303_v24, %v5287_v50 }
 0xfaa   :  { %v3510_v57 = vpop.permute.xlu1 %3509 }
 0xfab   :  { %v3261_v4 = vpack.c.bf16 %v3253_v63, %v3253_v63  ;;  %v3515_v50 = vsel %vm1226_vm6, %v3510_v57, 0 }
 0xfad   :  { %v3232_v27 = vpop.xlane.xlu0 %3231  ;;  %5056 = vmatmul.mubr.msk.bf16.vlgmr.msra.gmra.mrb[104].mxu1 %vm735_vm5, %v3261_v4  ;;  %v3812_v4 = vsel %vm1226_vm6, %v4489_v9, 0 }
 0xfae   :  { %5308 = vrcp.f32 %v3232_v27  ;;  %5066 = vmatpush3.bf16.msra.mxu1 %v3371_v26  ;;  %5067 = vmatprep.mubr.msk.bf16.mxu1 %vm5356_vm4, %v5355_v11 }
 0xfaf   :  { %5077 = vmatprep.subr.bf16.mxu1 %v5355_v11 }
 0xfb0   :  { %v5305_v42 = vpop.eup %5304 }
 0xfb1   :  { %v5307_v6 = vpop.eup %5306  ;;  %v3254_v28 = vmul.f32 %v5305_v42, %v5289_v17  ;;  %v3462_v33 = vpop.permute.xlu0 %3461 }
 0xfb2   :  { %v3255_v29 = vmul.f32 %v5307_v6, %v5291_v31  ;;  %v3467_v43 = vsel %vm1226_vm6, %v3462_v33, 0  ;;  %v3858_v6 = vsel %vm1226_vm6, %v4490_v21, 0 }
 0xfb3   :  { %v3262_v35 = vpack.c.bf16 %v3254_v28, %v3254_v28 }
 0xfb4   :  { %v3263_v40 = vpack.c.bf16 %v3255_v29, %v3255_v29 }
 0xfb5   :  { %5062 = vmatmul.mubr.msk.bf16.vlgmr.msra.gmra.mrb[100].mxu0 %vm735_vm5, %v3262_v35  ;;  %v4491_v35 = vld [vmem:[%s6406_s7 + $0x34] sm:$0xf] }
 0xfb6   :  { %5068 = vmatmul.mubr.msk.bf16.vlgmr.msra.gmra.mrb[108].mxu1 %vm735_vm5, %v3263_v40  ;;  %5072 = vmatpush3.bf16.msra.mxu0 %v3419_v16 }
 0xfb7   :  { %5078 = vmatpush3.bf16.msra.mxu1 %v3467_v43  ;;  %5073 = vmatprep.mubr.msk.bf16.mxu0 %vm5356_vm4, %v5355_v11 }
 0xfb8   :  { %v5309_v44 = vpop.eup %5308  ;;  %5083 = vmatprep.subr.bf16.mxu0 %v5355_v11  ;;  %5079 = vmatprep.mubr.msk.bf16.mxu1 %vm5356_vm4, %v5355_v11 }
 0xfb9   :  { %v3256_v58 = vmul.f32 %v5309_v44, %v6184_v46  ;;  %5089 = vmatprep.subr.bf16.mxu1 %v5355_v11  ;;  %v3904_v44 = vsel %vm1226_vm6, %v4491_v35, 0 }
 0xfbb   :  { %v3264_v49 = vpack.c.bf16 %v3256_v58, %v3256_v58 }
 0xfbd   :  { %5074 = vmatmul.mubr.msk.bf16.vlgmr.msra.gmra.mrb[104].mxu0 %vm735_vm5, %v3264_v49  ;;  %v4492_v49 = vld [vmem:[%s6406_s7 + $0x38] sm:$0xf] }
 0xfbe   :  { %5084 = vmatpush3.bf16.msra.mxu0 %v3515_v50  ;;  %5085 = vmatprep.mubr.msk.bf16.mxu0 %vm5356_vm4, %v5355_v11 }
 0xfbf   :  { %5095 = vmatprep.subr.bf16.mxu0 %v5355_v11 }
 0xfdb   :  { %v3235_v19 = vpop.xlane.xlu1 %3234 }
 0xfdc   :  { %5310 = vrcp.f32 %v3235_v19 }
 0xfdf   :  { %v3241_v36 = vpop.xlane.xlu1 %3240 }
 0xfe0   :  { %5312 = vrcp.f32 %v3241_v36 }
 0xfe2   :  { %v3238_v48 = vpop.xlane.xlu0 %3237 }
 0xfe3   :  { %5314 = vrcp.f32 %v3238_v48  ;;  %v3244_v41 = vpop.xlane.xlu1 %3243  ;;  %v3950_v48 = vsel %vm1226_vm6, %v4492_v49, 0 }
 0xfe4   :  { %5316 = vrcp.f32 %v3244_v41 }
 0xfe6   :  { %v5311_v17 = vpop.eup %5310  ;;  %v3558_v53 = vpop.permute.xlu0 %3557 }
 0xfe7   :  { %v3257_v31 = vmul.f32 %v5311_v17, %v6193_v55  ;;  %v3563_v51 = vsel %vm1226_vm6, %v3558_v53, 0  ;;  %v3606_v2 = vpop.permute.xlu1 %3605  ;;  %v4487_v55 = vld [vmem:[%s6406_s7 + $0x24] sm:$0xf] }
 0xfe8   :  { %v3611_v8 = vsel %vm1226_vm6, %v3606_v2, 0  ;;  %v3720_v37 = vsel %vm1226_vm6, %v4487_v55, 0 }
 0xfe9   :  { %v3265_v45 = vpack.c.bf16 %v3257_v31, %v3257_v31  ;;  %v4493_v31 = vld [vmem:[%s6406_s7 + $0x3c] sm:$0xf] }
 0xfea   :  { %v5313_v46 = vpop.eup %5312 }
 0xfeb   :  { %5080 = vmatmul.mubr.msk.bf16.vlgmr.msra.gmra.mrb[112].mxu1 %vm735_vm5, %v3265_v45  ;;  %v3259_v56 = vmul.f32 %v5313_v46, %v6197_v62  ;;  %v4488_v62 = vld [vmem:[%s6406_s7 + $0x28] sm:$0xf] }
 0xfec   :  { %5090 = vmatpush3.bf16.msra.mxu1 %v3563_v51  ;;  %5091 = vmatprep.mubr.msk.bf16.mxu1 %vm5356_vm4, %v5355_v11  ;;  %v3766_v13 = vsel %vm1226_vm6, %v4488_v62, 0 }
 0xfed   :  { %v5315_v54 = vpop.eup %5314  ;;  %5101 = vmatprep.subr.bf16.mxu1 %v5355_v11  ;;  %v3267_v7 = vpack.c.bf16 %v3259_v56, %v3259_v56 }
 0xfee   :  { %v3258_v60 = vmul.f32 %v5315_v54, %v6199_v10  ;;  %v5317_v5 = vpop.eup %5316  ;;  %v3996_v54 = vsel %vm1226_vm6, %v4493_v31, 0 }
 0xfef   :  { %v3260_v61 = vmul.f32 %v5317_v5, %v6203_v12 }
 0xff0   :  { %v3266_v3 = vpack.c.bf16 %v3258_v60, %v3258_v60 }
 0xff1   :  { %v3268_v59 = vpack.c.bf16 %v3260_v61, %v3260_v61 }
 0xff2   :  { %5086 = vmatmul.mubr.msk.bf16.vlgmr.msra.gmra.mrb[108].mxu0 %vm735_vm5, %v3266_v3 }
 0xff3   :  { %5092 = vmatmul.mubr.msk.bf16.vlgmr.msra.gmra.mrb[116].mxu1 %vm735_vm5, %v3267_v7  ;;  %5096 = vmatpush3.bf16.msra.mxu0 %v3611_v8 }
 0xff4   :  { %5097 = vmatprep.mubr.msk.bf16.mxu0 %vm5356_vm4, %v5355_v11  ;;  %5103 = vmatprep.mubr.msk.bf16.mxu1 %vm5356_vm4, %v5355_v11 }
 0xff5   :  { %5107 = vmatprep.subr.bf16.mxu0 %v5355_v11  ;;  %5102 = vmatpush3.bf16.msra.mxu1 %v3674_v1 }
 0xff6   :  { %5113 = vmatprep.subr.bf16.mxu1 %v5355_v11 }
 0xffa   :  { %5098 = vmatmul.mubr.msk.bf16.vlgmr.msra.gmra.mrb[112].mxu0 %vm735_vm5, %v3268_v59 }
 0xffb   :  { %5109 = vmatprep.mubr.msk.bf16.mxu0 %vm5356_vm4, %v5355_v11  ;;  %5108 = vmatpush3.bf16.msra.mxu0 %v3720_v37 }
 0xffc   :  { %5119 = vmatprep.subr.bf16.mxu0 %v5355_v11 }
0x1080   :  { %v3311_v10 = vpop.f32.mrb[104].mxu1 }
0x1081   :  { %v3653_v34 = vpack.c.bf16 %v3311_v10, %v3311_v10  ;;  %v5057_v12 = vpop.f32.mrb[105].mxu1 }
0x1082   :  { %v3314_v15 = vpop.f32.mrb[106].mxu1 }
0x1083   :  { %v5058_v18 = vpop.f32.mrb[107].mxu1  ;;  %5104 = vmatmul.mubr.msk.bf16.vlgmr.msra.gmra.mrb[120].mxu1 %vm735_vm5, %v3653_v34 }
0x1084   :  { %5114 = vmatpush3.bf16.msra.mxu1 %v3766_v13  ;;  %5115 = vmatprep.mubr.msk.bf16.mxu1 %vm5356_vm4, %v5355_v11 }
0x1085   :  { %5125 = vmatprep.subr.bf16.mxu1 %v5355_v11 }
0x1088   :  { %v3359_v22 = vpop.f32.mrb[100].mxu0 }
0x1089   :  { %v3654_v23 = vpack.c.bf16 %v3359_v22, %v3359_v22  ;;  %v3407_v24 = vpop.f32.mrb[108].mxu1  ;;  %v5063_v63 = vpop.f32.mrb[101].mxu0 }
0x108a   :  { %v3655_v26 = vpack.c.bf16 %v3407_v24, %v3407_v24  ;;  %v5069_v27 = vpop.f32.mrb[109].mxu1  ;;  %v3362_v42 = vpop.f32.mrb[102].mxu0 }
0x108b   :  { %v3410_v28 = vpop.f32.mrb[110].mxu1  ;;  %v5064_v29 = vpop.f32.mrb[103].mxu0  ;;  %5110 = vmatmul.mubr.msk.bf16.vlgmr.msra.gmra.mrb[116].mxu0 %vm735_vm5, %v3654_v23  ;;  %v6324_v27 = vld [vmem:[%s6410_s11 + $0x8] sm:$0x3f] }
0x108c   :  { %v5070_v33 = vpop.f32.mrb[111].mxu1  ;;  %5116 = vmatmul.mubr.msk.bf16.vlgmr.msra.gmra.mrb[124].mxu1 %vm735_vm5, %v3655_v26  ;;  %5120 = vmatpush3.bf16.msra.mxu0 %v3812_v4 }
0x108d   :  { %5121 = vmatprep.mubr.msk.bf16.mxu0 %vm5356_vm4, %v5355_v11  ;;  %5126 = vmatpush3.bf16.msra.mxu1 %v3858_v6  ;;  %v4055_v6 = vrot.slane %v6324_v27, %v5694_v32 }
0x108e   :  { %5127 = vmatprep.mubr.msk.bf16.mxu1 %vm5356_vm4, %v5355_v11  ;;  %5131 = vmatprep.subr.bf16.mxu0 %v5355_v11 }
0x108f   :  { %5137 = vmatprep.subr.bf16.mxu1 %v5355_v11 }
0x1090   :  { %v3455_v40 = vpop.f32.mrb[104].mxu0 }
0x1091   :  { %v3656_v16 = vpack.c.bf16 %v3455_v40, %v3455_v40  ;;  %v5075_v43 = vpop.f32.mrb[105].mxu0 }
0x1092   :  { %v3458_v58 = vpop.f32.mrb[106].mxu0 }
0x1093   :  { %v5076_v57 = vpop.f32.mrb[107].mxu0  ;;  %5122 = vmatmul.mubr.msk.bf16.vlgmr.msra.gmra.mrb[120].mxu0 %vm735_vm5, %v3656_v16 }
0x1094   :  { %5132 = vmatpush3.bf16.msra.mxu0 %v3904_v44  ;;  %5133 = vmatprep.mubr.msk.bf16.mxu0 %vm5356_vm4, %v5355_v11 }
0x1095   :  { %5143 = vmatprep.subr.bf16.mxu0 %v5355_v11 }
0x10be   :  { %v3503_v50 = vpop.f32.mrb[112].mxu1 }
0x10bf   :  { %v3657_v19 = vpack.c.bf16 %v3503_v50, %v3503_v50  ;;  %v5081_v36 = vpop.f32.mrb[113].mxu1 }
0x10c0   :  { %v3506_v41 = vpop.f32.mrb[114].mxu1 }
0x10c1   :  { %v5082_v17 = vpop.f32.mrb[115].mxu1  ;;  %5128 = vmatmul.mubr.msk.bf16.vlgmr.msra.gmra.mrb[128].mxu1 %vm735_vm5, %v3657_v19 }
0x10c2   :  { %5138 = vmatpush3.bf16.msra.mxu1 %v3950_v48  ;;  %5139 = vmatprep.mubr.msk.bf16.mxu1 %vm5356_vm4, %v5355_v11 }
0x10c3   :  { %5149 = vmatprep.subr.bf16.mxu1 %v5355_v11 }
0x10c5   :  { %v3551_v53 = vpop.f32.mrb[108].mxu0 }
0x10c6   :  { %v3658_v45 = vpack.c.bf16 %v3551_v53, %v3551_v53  ;;  %v3599_v46 = vpop.f32.mrb[116].mxu1  ;;  %v5087_v51 = vpop.f32.mrb[109].mxu0 }
0x10c7   :  { %v3659_v56 = vpack.c.bf16 %v3599_v46, %v3599_v46  ;;  %v5093_v60 = vpop.f32.mrb[117].mxu1  ;;  %v3554_v2 = vpop.f32.mrb[110].mxu0 }
0x10c8   :  { %v3602_v3 = vpop.f32.mrb[118].mxu1  ;;  %v5088_v5 = vpop.f32.mrb[111].mxu0  ;;  %5134 = vmatmul.mubr.msk.bf16.vlgmr.msra.gmra.mrb[124].mxu0 %vm735_vm5, %v3658_v45 }
0x10c9   :  { %v5094_v7 = vpop.f32.mrb[119].mxu1  ;;  %5140 = vmatmul.mubr.msk.bf16.vlgmr.msra.gmra.mrb[132].mxu1 %vm735_vm5, %v3659_v56  ;;  %5144 = vmatpush3.bf16.msra.mxu0 %v3996_v54 }
0x10ca   :  { %5145 = vmatprep.mubr.msk.bf16.mxu0 %vm5356_vm4, %v5355_v11  ;;  %5153 = vmatprep.mubr.msk.bf16.mxu1 %vm5356_vm4, %v5355_v11 }
0x10cb   :  { %5157 = vmatprep.subr.bf16.mxu0 %v5355_v11 }
0x10cd   :  { %v3647_v8 = vpop.f32.mrb[112].mxu0 }
0x10ce   :  { %v3660_v61 = vpack.c.bf16 %v3647_v8, %v3647_v8  ;;  %v5099_v59 = vpop.f32.mrb[113].mxu0 }
0x10cf   :  { %v3650_v25 = vpop.f32.mrb[114].mxu0 }
0x10d0   :  { %v5100_v1 = vpop.f32.mrb[115].mxu0  ;;  %5146 = vmatmul.mubr.msk.bf16.vlgmr.msra.gmra.mrb[128].mxu0 %vm735_vm5, %v3660_v61 }
0x10d1   :  { %5165 = vmatprep.mubr.msk.bf16.mxu0 %vm5356_vm4, %v5355_v11 }
0x1156   :  { %v3710_v55 = vpop.f32.mrb[120].mxu1 }
0x1157   :  { %v5105_v37 = vpop.f32.mrb[121].mxu1  ;;  %v4038_v12 = vsel %vm153_vm3, %v3710_v55, 0.0 }
0x1158   :  { %v3713_v62 = vpop.f32.mrb[122].mxu1 }
0x1159   :  { %v5106_v10 = vpop.f32.mrb[123].mxu1 }
0x115e   :  { %v3756_v34 = vpop.f32.mrb[116].mxu0 }
0x115f   :  { %v4039_v13 = vsel %vm153_vm3, %v3756_v34, 0.0  ;;  %v3802_v15 = vpop.f32.mrb[124].mxu1  ;;  %v5111_v18 = vpop.f32.mrb[117].mxu0 }
0x1160   :  { %v4040_v9 = vadd.f32 %v4039_v13, %v4038_v12  ;;  %v5117_v21 = vpop.f32.mrb[125].mxu1  ;;  %v3759_v22 = vpop.f32.mrb[118].mxu0  ;;  %v4041_v23 = vsel %vm153_vm3, %v3802_v15, 0.0  ;;  %v5233_v18 = vld [vmem:[%s6407_s8 + $0x18] sm:$0xff]  }
0x1161   :  { %v3805_v24 = vpop.f32.mrb[126].mxu1  ;;  %v5112_v63 = vpop.f32.mrb[119].mxu0 }
0x1162   :  { %v4042_v4 = vadd.f32 %v4041_v23, %v4040_v9  ;;  %v5118_v26 = vpop.f32.mrb[127].mxu1 }
0x1163   :  { %v4089_v26 = vrot.slane %v6324_v27, %v2040_v14  ;;  %v5235_v14 = vld [vmem:[%s6409_s10 + $0x28] sm:$0xff]  }
0x1166   :  { %v3848_v42 = vpop.f32.mrb[120].mxu0 }
0x1167   :  { %v4043_v28 = vsel %vm153_vm3, %v3848_v42, 0.0  ;;  %v5123_v29 = vpop.f32.mrb[121].mxu0 }
0x1168   :  { %v4044_v33 = vadd.f32 %v4043_v28, %v4042_v4  ;;  %v3851_v35 = vpop.f32.mrb[122].mxu0 }
0x1169   :  { %v5124_v40 = vpop.f32.mrb[123].mxu0 }
0x116a   :  { %v4056_v16 = vadd.f32 %v4055_v6, %v4044_v33  ;;  %v4095_v33 = vrot.slane %v6324_v27, %v2046_v20  ;;  %v5236_v20 = vld [vmem:[%s6409_s10 + $0x30] sm:$0xff]  }
0x116c   :  { %v4058_v43 = vadd.f32 %v4056_v16, %v5971_v47 }
0x116e   :  { %v4060_v44 = vsel %vm153_vm3, %v4058_v43, 0.0 }
0x116f   :  { %4061 = vadd.xlane.f32.xlu0 %v4060_v44  ;;  %v5234_v44 = vld [vmem:[%s6409_s10 + $0x20] sm:$0xff]  }
0x1170   :  { %5158 = vmatpush3.bf16.msra.mxu0 %v5234_v44  ;;  %v4305_v44 = vrot.slane %v6324_v27, %v2253_v39 }
0x1171   :  { %5159 = vmatprep.subr.bf16.mxu0 %v5355_v11 }
0x1174   :  { %5160 = vmatpush3.bf16.msra.mxu0 %v5235_v14 }
0x1175   :  { %5161 = vmatprep.subr.bf16.mxu0 %v5355_v11 }
0x1178   :  { %5162 = vmatpush3.bf16.msra.mxu0 %v5236_v20 }
0x1179   :  { %5163 = vmatprep.subr.bf16.mxu0 %v5355_v11 }
0x1194   :  { %v3894_v58 = vpop.f32.mrb[128].mxu1 }
0x1195   :  { %v5129_v57 = vpop.f32.mrb[129].mxu1  ;;  %v4045_v36 = vsel %vm153_vm3, %v3894_v58, 0.0  ;;  %v5237_v58 = vld [vmem:[%s6409_s10 + $0x38] sm:$0xff]  }
0x1196   :  { %v3897_v49 = vpop.f32.mrb[130].mxu1  ;;  %5164 = vmatpush3.bf16.msra.mxu0 %v5237_v58  ;;  %v4507_v57 = vld [vmem:[%s6408_s9 + $0x1] ss:$0 sm:$0xff]  ;;  %s5359_s9 = smov [#allocation2]  }
0x1197   :  { %v5130_v50 = vpop.f32.mrb[131].mxu1  ;;  %s4315_s10 = sshll.u32 %s5359_s9, 4  ;;  %s4316_s10 = int_to_ptr.vmem [resolvable:$true] %s4315_s10 }
0x1198   :  { %s5330_s16 = scalar_lea.vmem %s4316_s10, 256  ;;  %p5335_p1 = scmp.lt.s32.totalorder %s4316_s10, %s4316_s10 }
0x1199   :  { %p5331_p0 = scmp.ne.s32.totalorder %s4316_s10, %s5330_s16  ;;  %p5336_p2 = scmp.lt.s32.totalorder %s5330_s16, %s5330_s16 }
0x119b   :  { %v3940_v19 = vpop.f32.mrb[124].mxu0  ;;  %p5337_p3 = por %p5336_p2, %p5335_p1 }
0x119c   :  { %v4046_v32 = vsel %vm153_vm3, %v3940_v19, 0.0  ;;  %v3986_v48 = vpop.f32.mrb[132].mxu1  ;;  %v5135_v41 = vpop.f32.mrb[125].mxu0 }
0x119d   :  { %v4047_v17 = vadd.f32 %v4046_v32, %v4045_v36  ;;  %v5141_v31 = vpop.f32.mrb[133].mxu1  ;;  %v3943_v53 = vpop.f32.mrb[126].mxu0  ;;  %v4048_v45 = vsel %vm153_vm3, %v3986_v48, 0.0  ;;  %p5338_p4 = pnand %p5337_p3, %p5331_p0 }
0x119e   :  { %v3989_v47 = vpop.f32.mrb[134].mxu1  ;;  %v5136_v46 = vpop.f32.mrb[127].mxu0 }
0x119f   :  { %v4049_v51 = vadd.f32 %v4048_v45, %v4047_v17  ;;  %v5142_v54 = vpop.f32.mrb[135].mxu1 }
0x11a3   :  { %v4032_v56 = vpop.f32.mrb[128].mxu0 }
0x11a4   :  { %v4050_v60 = vsel %vm153_vm3, %v4032_v56, 0.0  ;;  %v5147_v2 = vpop.f32.mrb[129].mxu0 }
0x11a5   :  { %v4051_v3 = vadd.f32 %v4050_v60, %v4049_v51  ;;  %v4035_v5 = vpop.f32.mrb[130].mxu0 }
0x11a6   :  { %v5148_v7 = vpop.f32.mrb[131].mxu0 }
0x11a7   :  { %v4057_v8 = vadd.f32 %v4055_v6, %v4051_v3 }
0x11a9   :  { %v4059_v61 = vadd.f32 %v4057_v8, %v5991_v52  ;;  %v5232_v52 = vld [vmem:[%s6407_s8 + $0x10] sm:$0xff]  }
0x11aa   :  { %5150 = vmatpush3.bf16.msra.mxu1 %v5232_v52 }
0x11ab   :  { %v4063_v59 = vsel %vm153_vm3, %v4059_v61, 0.0  ;;  %5151 = vmatprep.subr.bf16.mxu1 %v5355_v11 }
0x11ac   :  { %4064 = vadd.xlane.f32.xlu1 %v4063_v59 }
0x11ae   :  { %5152 = vmatpush3.bf16.msra.mxu1 %v5233_v18 }
0x11fc   :  { %v4062_v25 = vpop.xlane.xlu0 %4061 }
0x11fd   :  { %v4066_v1 = vmul.f32 0.03125, %v4062_v25  ;;  %v4199_v25 = vrot.slane %v6324_v27, %v2147_v0 }
0x11ff   :  { %v4068_v55 = vsub.f32 %v4058_v43, %v4066_v1 }
0x1201   :  { %v4070_v37 = vmul.f32 %v4068_v55, %v4068_v55 }
0x1203   :  { %v4072_v62 = vsel %vm153_vm3, %v4070_v37, 0.0 }
0x1204   :  { %4073 = vadd.xlane.f32.xlu0 %v4072_v62 }
0x1239   :  { %v4065_v10 = vpop.xlane.xlu1 %4064 }
0x123a   :  { %v4067_v34 = vmul.f32 0.03125, %v4065_v10 }
0x123c   :  { %v4069_v12 = vsub.f32 %v4059_v61, %v4067_v34 }
0x123e   :  { %v4071_v13 = vmul.f32 %v4069_v12, %v4069_v12 }
0x1240   :  { %v4075_v15 = vsel %vm153_vm3, %v4071_v13, 0.0 }
0x1241   :  { %4076 = vadd.xlane.f32.xlu0 %v4075_v15 }
0x1291   :  { %v4074_v9 = vpop.xlane.xlu0 %4073 }
0x1292   :  { %v4078_v21 = vmul.f32 0.03125, %v4074_v9 }
0x1294   :  { %v4080_v22 = vadd.f32 1e-12, %v4078_v21 }
0x1296   :  { %5318 = vrsqrt.f32 %v4080_v22 }
0x12a0   :  { %v5319_v4 = vpop.eup %5318 }
0x12a1   :  { %v4084_v42 = vmul.f32 %v5319_v4, %v4068_v55 }
0x12a3   :  { %v4090_v28 = vmul.f32 %v4089_v26, %v4084_v42 }
0x12a5   :  { %v4096_v40 = vadd.f32 %v4095_v33, %v4090_v28 }
0x12ce   :  { %v4077_v23 = vpop.xlane.xlu0 %4076 }
0x12cf   :  { %v4079_v24 = vmul.f32 0.03125, %v4077_v23 }
0x12d1   :  { %v4081_v63 = vadd.f32 1e-12, %v4079_v24 }
0x12d3   :  { %5320 = vrsqrt.f32 %v4081_v63 }
0x12dd   :  { %v5321_v6 = vpop.eup %5320 }
0x12de   :  { %v4085_v29 = vmul.f32 %v5321_v6, %v4069_v12 }
0x12e0   :  { %v4091_v35 = vmul.f32 %v4089_v26, %v4085_v29 }
0x12e2   :  { %v4097_v16 = vadd.f32 %v4095_v33, %v4091_v35 }
0x12e4   :  { %v4098_v43 = vpack.c.bf16 %v4097_v16, %v4096_v40 }
0x12e6   :  { %5154 = vmatmul.mubr.msk.bf16.vlgmr.msra.gmra.mrb[136].mxu1 %vm153_vm3, %v4098_v43 }
0x13b9   :  { %v4161_v49 = vpop.f32.mrb[136].mxu1 }
0x13ba   :  { %v4162_v50 = vadd.f32 %v4507_v57, %v4161_v49  ;;  %v5155_v19 = vpop.f32.mrb[137].mxu1 }
0x13bb   :  { %v4164_v36 = vpop.f32.mrb[138].mxu1 }
0x13bc   :  { %v4168_v32 = vmul.f32 %v4162_v50, %v4162_v50  ;;  %v4165_v48 = vadd.f32 %v4507_v57, %v4164_v36  ;;  %v5156_v41 = vpop.f32.mrb[139].mxu1 }
0x13be   :  { %v4170_v17 = vmul.f32 %v4168_v32, %v4162_v50  ;;  %v4169_v31 = vmul.f32 %v4165_v48, %v4165_v48 }
0x13c0   :  { %v4172_v53 = vmul.f32 0.044715, %v4170_v17  ;;  %v4171_v11 = vmul.f32 %v4169_v31, %v4165_v48 }
0x13c2   :  { %v4174_v45 = vadd.f32 %v4172_v53, %v4162_v50  ;;  %v4173_v47 = vmul.f32 0.044715, %v4171_v11 }
0x13c4   :  { %v4176_v46 = vmul.f32 0.7978846, %v4174_v45  ;;  %v4175_v51 = vadd.f32 %v4173_v47, %v4165_v48 }
0x13c6   :  { %5322 = vtanh.f32 %v4176_v46  ;;  %v4177_v54 = vmul.f32 0.7978846, %v4175_v51 }
0x13c8   :  { %5324 = vtanh.f32 %v4177_v54 }
0x13d0   :  { %v5323_v56 = vpop.eup %5322 }
0x13d1   :  { %v4180_v60 = vadd.f32 1.0, %v5323_v56 }
0x13d2   :  { %v5325_v2 = vpop.eup %5324 }
0x13d3   :  { %v4182_v3 = vmul.f32 0.5, %v4180_v60  ;;  %v4181_v5 = vadd.f32 1.0, %v5325_v2 }
0x13d5   :  { %v4183_v7 = vmul.f32 0.5, %v4181_v5  ;;  %v4184_v8 = vmul.f32 %v4182_v3, %v4162_v50 }
0x13d7   :  { %v4185_v61 = vmul.f32 %v4183_v7, %v4165_v48 }
0x13d9   :  { %v4186_v59 = vpack.c.bf16 %v4185_v61, %v4184_v8 }
0x13db   :  { %5166 = vmatmul.mubr.msk.bf16.vlgmr.msra.gmra.mrb[132].mxu0 %vm69_vm0, %v4186_v59 }
0x14ae   :  { %v4261_v1 = vpop.f32.mrb[132].mxu0 }
0x14af   :  { %v4262_v55 = vadd.f32 %v4261_v1, %v4199_v25  ;;  %v5167_v37 = vpop.f32.mrb[133].mxu0 }
0x14b0   :  { %v4264_v62 = vpop.f32.mrb[134].mxu0 }
0x14b1   :  { %v4265_v10 = vadd.f32 %v4264_v62, %v4199_v25  ;;  %v5168_v34 = vpop.f32.mrb[135].mxu0  ;;  %v4268_v12 = vadd.f32 %v4262_v55, %v4096_v40  ;;  %v4299_v40 = vrot.slane %v6324_v27, %v2247_v38 }
0x14b3   :  { %v4270_v13 = vsel %vm153_vm3, %v4268_v12, 0.0  ;;  %v4269_v15 = vadd.f32 %v4265_v10, %v4097_v16 }
0x14b4   :  { %4271 = vadd.xlane.f32.xlu1 %v4270_v13 }
0x14b5   :  { %v4273_v52 = vsel %vm153_vm3, %v4269_v15, 0.0 }
0x14b6   :  { %4274 = vadd.xlane.f32.xlu0 %v4273_v52 }
0x1541   :  { %v4272_v18 = vpop.xlane.xlu1 %4271 }
0x1542   :  { %v4276_v9 = vmul.f32 0.03125, %v4272_v18 }
0x1543   :  { %v4275_v21 = vpop.xlane.xlu0 %4274 }
0x1544   :  { %v4278_v22 = vsub.f32 %v4268_v12, %v4276_v9  ;;  %v4277_v23 = vmul.f32 0.03125, %v4275_v21 }
0x1546   :  { %v4279_v0 = vsub.f32 %v4269_v15, %v4277_v23  ;;  %v4280_v24 = vmul.f32 %v4278_v22, %v4278_v22 }
0x1548   :  { %v4282_v63 = vsel %vm153_vm3, %v4280_v24, 0.0  ;;  %v4281_v4 = vmul.f32 %v4279_v0, %v4279_v0 }
0x1549   :  { %4283 = vadd.xlane.f32.xlu1 %v4282_v63 }
0x154a   :  { %v4285_v26 = vsel %vm153_vm3, %v4281_v4, 0.0 }
0x154b   :  { %4286 = vadd.xlane.f32.xlu0 %v4285_v26 }
0x15d6   :  { %v4284_v42 = vpop.xlane.xlu1 %4283 }
0x15d7   :  { %v4288_v6 = vmul.f32 0.03125, %v4284_v42 }
0x15d8   :  { %v4287_v28 = vpop.xlane.xlu0 %4286 }
0x15d9   :  { %v4290_v29 = vadd.f32 1e-12, %v4288_v6  ;;  %v4289_v33 = vmul.f32 0.03125, %v4287_v28 }
0x15db   :  { %5326 = vrsqrt.f32 %v4290_v29  ;;  %v4291_v35 = vadd.f32 1e-12, %v4289_v33 }
0x15dd   :  { %5328 = vrsqrt.f32 %v4291_v35 }
0x15e5   :  { %v5327_v16 = vpop.eup %5326 }
0x15e6   :  { %v4294_v43 = vmul.f32 %v5327_v16, %v4278_v22 }
0x15e7   :  { %v5329_v14 = vpop.eup %5328 }
0x15e8   :  { %v4295_v20 = vmul.f32 %v5329_v14, %v4279_v0  ;;  %v4300_v58 = vmul.f32 %v4299_v40, %v4294_v43 }
0x15ea   :  { %v4301_v57 = vmul.f32 %v4299_v40, %v4295_v20  ;;  %v4306_v49 = vadd.f32 %v4305_v44, %v4300_v58 }
0x15ec   :  { %v4307_v50 = vadd.f32 %v4305_v44, %v4301_v57  ;;  %4308 = vst.msk [vmem:[#allocation2] sm:$0xff] %vm153_vm3, %v4306_v49 }
0x15ee   :  { %4309 = vst.msk [vmem:[#allocation2 + $0x8] sm:$0xff] %vm153_vm3, %v4307_v50 }
0x15ef   :  { %5341 = shalt.err (!%p5338_p4)
}
0x15f0   :  { %s5342_s19 = scalar_lea.hbm %s6411_s12, 256 }
0x15f1   :  { %p5343_p5 = scmp.ne.s32.totalorder %s6411_s12, %s5342_s19  ;;  %p5346_p6 = scmp.lt.u32.totalorder %s5342_s19, %s6411_s12 }
0x15f3   :  { %p5348_p7 = pnand %p5346_p6, %p5343_p5 }
0x15f5   :  { %5351 = shalt.err (!%p5348_p7)
}
0x15f6   :  { %s5360_s5 = smov 128   ;;  %s5361_s21 = smov 8  }
0x15f7   :  { %4321 = dma.vmem_to_hbm [thread:$0]  %s4316_s10, 256, %s6411_s12, [#allocation3], %s5360_s5, %s5360_s5, %s5361_s21  }
0x15f8   :  { %5352 = dma.done.wait [#allocation3], 256  }
0x15f9   :  { %5353 = vsyncadd [#allocation3], 4294967040 }
0x15fa   :  { %4325 = vsyncpa [#allocation3], 1 }

</bundles_post_ra>
